<compile_context>
chip_gen: v6e
topology: v6e:2x2x1
jax: 0.10.0
libtpu: 0.0.40
codegen_flags: <defaults>
</compile_context>

<pallas_src>
import numpy as np

import jax
import jax.numpy as jnp
from jax.experimental import pallas as pl
from jax.experimental.pallas import tpu as pltpu


# ----------------------------------------------------------------------------
# Feature / hardware probes
# ----------------------------------------------------------------------------

_SINGLE_BUFFER_OK = None


def _single_buffer_params_supported():
    """Explicit feature probe for single-buffered (pl.Buffered(1)) BlockSpecs.

    Compiles and runs a tiny copy kernel once (result cached) instead of
    wrapping the real pallas_call in a broad try/except, which would not fire
    under an outer jit and would mask genuine kernel bugs.  Concrete numpy
    input keeps the probe eager even if this is called inside a trace.
    """
    global _SINGLE_BUFFER_OK
    if _SINGLE_BUFFER_OK is not None:
        return _SINGLE_BUFFER_OK
    if not hasattr(pl, "Buffered"):
        _SINGLE_BUFFER_OK = False
        return _SINGLE_BUFFER_OK

    def probe_kernel(x_ref, o_ref):
        o_ref[...] = x_ref[...]

    try:
        x = np.zeros((8, 128), np.float32)
        fn = pl.pallas_call(
            probe_kernel,
            out_shape=jax.ShapeDtypeStruct((16, 128), jnp.float32),
            grid=(2,),
            in_specs=[pl.BlockSpec((8, 128), lambda i: (0, 0),
                                   pipeline_mode=pl.Buffered(1))],
            out_specs=pl.BlockSpec((8, 128), lambda i: (i, 0)),
        )
        jax.block_until_ready(fn(x))
        _SINGLE_BUFFER_OK = True
    except Exception:  # feature probe only; main kernel is never wrapped
        _SINGLE_BUFFER_OK = False
    return _SINGLE_BUFFER_OK


def _default_elementwise_dtype():
    """bf16 bias-add/ReLU on v6e/v7x (bf16 VALU); f32 on v5e and older."""
    try:
        kind = jax.devices()[0].device_kind.lower()
    except Exception:
        return jnp.float32
    for tag in ("v2", "v3", "v4", "v5"):
        if tag in kind:
            return jnp.float32
    return jnp.bfloat16


# ----------------------------------------------------------------------------
# Kernel
# ----------------------------------------------------------------------------

def _make_mlp_kernel(layer_dims, bias_offsets, output_dim,
                     first_layer_as_outer_product, bf16_elementwise):
    """Fused MLP kernel.

    Ref order: x_ref, w_0 ... w_{L-1}, bias_cat_ref, o_ref.
    ReLU after every layer except the last (matches the PyTorch Sequential).
    """
    num_layers = len(layer_dims)

    def kernel(x_ref, *rest):
        *w_refs, b_ref, o_ref = rest
        assert len(w_refs) == num_layers

        h = x_ref[...]                                   # (tile, input_dim) f32
        for li, (d_in, d_out) in enumerate(layer_dims):
            last = li == num_layers - 1
            off = bias_offsets[li]
            b = b_ref[:, off:off + d_out]                # (1, d_out)
            w = w_refs[li][...]                          # (d_in, d_out)

            if li == 0 and first_layer_as_outer_product:
                # K == input_dim is tiny (e.g. 2): a couple of VPU
                # broadcast-mul-adds beat a degenerate K=2 MXU matmul.
                # The weight is kept f32 (only KBs; bf16 saves nothing).
                # TODO(synk): bundle-dump check that the h[:, k:k+1] lane
                # broadcast does not lower to per-vreg copies; if it does,
                # switch layer 0 to a padded-K MXU matmul on v6e/v7x.
                acc = h[:, 0:1] * w[0:1, :]
                for k in range(1, d_in):
                    acc = acc + h[:, k:k + 1] * w[k:k + 1, :]
                h = acc + b                              # stays f32
            else:
                # bf16 x bf16 MXU matmul with f32 accumulation.
                h = jnp.dot(h.astype(jnp.bfloat16), w,
                            preferred_element_type=jnp.float32)
                if bf16_elementwise and not last:
                    h = h.astype(jnp.bfloat16)           # single f32->bf16 pass
                h = h + b

            if not last:
                h = jnp.maximum(h, 0.0)                  # ReLU (VPU)
                if bf16_elementwise and h.dtype != jnp.bfloat16:
                    h = h.astype(jnp.bfloat16)           # feed next MXU matmul

        # Only the first output_dim lanes are real (last layer is padded to
        # 128 for the MXU); store them lane-masked.  The HBM writeback of a
        # (tile, output_dim) block is still contiguous.
        o_ref[...] = h[:, :output_dim].astype(o_ref.dtype)

    return kernel


# ----------------------------------------------------------------------------
# Wrapper
# ----------------------------------------------------------------------------

def _pick_batch_tile(batch):
    # Prefer tiles that (a) divide B, (b) are multiples of 128 (fill the MXU
    # M dimension), (c) leave an EVEN number of >= 2 grid steps so v7x's two
    # TensorCores split the "parallel" axis evenly, and (d) are as large as
    # possible to amortize the ~0.35 us per-grid-step overhead.
    cands = (2048, 1024, 512, 256, 128)
    for cand in cands:
        steps = batch // cand if batch % cand == 0 else 0
        if steps >= 2 and steps % 2 == 0:
            return cand
    for cand in cands:
        if batch % cand == 0 and batch // cand >= 2:
            return cand
    return batch  # single full-array block (always legal)


def basic_generator_forward(noise, weights, biases, *, batch_tile=None,
                            param_dtype=jnp.bfloat16, elementwise_dtype=None):
    """Run the fused MLP kernel.

    noise:   (B, input_dim) float32
    weights: list of (in_i, out_i) float32 arrays (pre-transposed vs. torch)
    biases:  list of (1, out_i) float32 arrays
    """
    B, input_dim = noise.shape
    output_dim = weights[-1].shape[1]

    if elementwise_dtype is None:
        elementwise_dtype = _default_elementwise_dtype()
    bf16_elementwise = jnp.dtype(elementwise_dtype) == jnp.dtype(jnp.bfloat16)

    if batch_tile is None:
        batch_tile = _pick_batch_tile(B)
    if B % batch_tile != 0:
        raise ValueError("batch must be divisible by batch_tile")
    if batch_tile != B and batch_tile % 8 != 0:
        raise ValueError("a tiled batch block must be a multiple of 8 rows")
    grid = (B // batch_tile,)

    # ---- parameter prep (runs once, outside the kernel) --------------------
    out_pad = (-output_dim) % 128
    first_layer_as_outer_product = input_dim <= 8

    ws = []
    for li, w in enumerate(weights):
        if li == 0 and first_layer_as_outer_product:
            ws.append(w.astype(jnp.float32))     # tiny; skip bf16 round-trip
        else:
            ws.append(w.astype(param_dtype))
    bias_dtype = jnp.bfloat16 if bf16_elementwise else jnp.float32
    bs = [b.astype(bias_dtype) for b in biases]
    if out_pad:
        # Keep the LAST-LAYER weight/bias padded to 128 lanes so the MXU
        # matmul stays N=128; the padded lanes never reach HBM.
        ws[-1] = jnp.pad(ws[-1], ((0, 0), (0, out_pad)))
        bs[-1] = jnp.pad(bs[-1], ((0, 0), (0, out_pad)))

    layer_dims = tuple((w.shape[0], w.shape[1]) for w in ws)
    bias_offsets = [0]
    for (_, d_out) in layer_dims[:-1]:
        # NOTE: offsets land on 128-lane boundaries for these widths; odd
        # widths would only cost a lane rotate, not correctness.
        bias_offsets.append(bias_offsets[-1] + d_out)
    bias_cat = jnp.concatenate(bs, axis=1)       # (1, sum(padded out_i))

    kernel = _make_mlp_kernel(layer_dims, tuple(bias_offsets), output_dim,
                              first_layer_as_outer_product, bf16_elementwise)

    single_buffer = _single_buffer_params_supported()

    # ---- cost / memory hints ------------------------------------------------
    flops = 2 * B * sum(d_in * d_out for d_in, d_out in layer_dims)
    param_bytes = sum(int(w.size) * w.dtype.itemsize for w in ws) \
        + int(bias_cat.size) * bias_cat.dtype.itemsize
    io_bytes = B * (input_dim + output_dim) * noise.dtype.itemsize
    cost = pl.CostEstimate(flops=flops, transcendentals=0,
                           bytes_accessed=param_bytes + io_bytes)

    max_width = max(d_out for _, d_out in layer_dims)
    act_bytes = 4 * batch_tile * max_width                 # f32 worst case
    io_tile_bytes = 2 * 4 * batch_tile * (input_dim + output_dim)
    vmem_need = ((1 if single_buffer else 2) * param_bytes
                 + io_tile_bytes + 4 * act_bytes + (2 << 20))
    # Actual need only (~a few MiB); never request v7x's whole 64 MiB VMEM.
    vmem_limit = int(min(32 << 20, max(8 << 20, vmem_need)))

    out_shape = jax.ShapeDtypeStruct((B, output_dim), noise.dtype)
    x_spec = pl.BlockSpec((batch_tile, input_dim), lambda i: (i, 0))
    out_spec = pl.BlockSpec((batch_tile, output_dim), lambda i: (i, 0))

    def param_spec(shape):
        if single_buffer:
            # Grid-invariant parameter: constant block index, so one VMEM
            # buffer suffices (no double-buffer, no re-DMA).
            return pl.BlockSpec(shape, lambda i: (0, 0),
                                pipeline_mode=pl.Buffered(1))
        return pl.BlockSpec(shape, lambda i: (0, 0))

    in_specs = [x_spec]
    in_specs += [param_spec(w.shape) for w in ws]
    in_specs.append(param_spec(bias_cat.shape))

    call = pl.pallas_call(
        kernel,
        out_shape=out_shape,
        grid_spec=pltpu.PrefetchScalarGridSpec(
            num_scalar_prefetch=0,
            grid=grid,
            in_specs=in_specs,
            out_specs=out_spec,
        ),
        compiler_params=pltpu.CompilerParams(
            dimension_semantics=("parallel",),
            vmem_limit_bytes=vmem_limit,
        ),
        cost_estimate=cost,
    )
    return call(noise, *ws, bias_cat)


# ----------------------------------------------------------------------------
# Parameter init / reference / self-test
# ----------------------------------------------------------------------------

def init_basic_generator_params(key, width=512, input_dim=2,
                                hidden_layers=2, output_dim=2,
                                init_var=0.02):
    """Matches Basic_Generator.weight_init('normal', 0.02):
    weights ~ N(0, 0.02 std), biases = 0.  Weights stored (in, out)."""
    dims = [input_dim] + [width] * (hidden_layers + 1) + [output_dim]
    weights, biases = [], []
    for li in range(len(dims) - 1):
        key, sub = jax.random.split(key)
        w = init_var * jax.random.normal(sub, (dims[li], dims[li + 1]),
                                         dtype=jnp.float32)
        b = jnp.zeros((1, dims[li + 1]), dtype=jnp.float32)
        weights.append(w)
        biases.append(b)
    return weights, biases


def _reference_forward(noise, weights, biases):
    """Plain-JAX reference (mirrors the PyTorch nn.Sequential)."""
    h = noise
    n = len(weights)
    for li, (w, b) in enumerate(zip(weights, biases)):
        h = h @ w + b
        if li < n - 1:
            h = jnp.maximum(h, 0.0)
    return h


if __name__ == "__main__":
    key = jax.random.PRNGKey(0)

    # Module-consistent shapes: width=512, input_dim=2, hidden_layers=2,
    # output_dim=2.
    width, input_dim, hidden_layers, output_dim = 512, 2, 2, 2

    pkey, nkey = jax.random.split(key)
    weights, biases = init_basic_generator_params(
        pkey, width=width, input_dim=input_dim,
        hidden_layers=hidden_layers, output_dim=output_dim)

    # The kernel keeps f32 accumulation but rounds hidden-layer weights (and,
    # on v6e/v7x, biases) to bf16; layer 0's weight stays f32 because
    # input_dim=2 takes the outer-product path.  Compare against a reference
    # built from the same rounded parameters so the tolerance only has to
    # cover bf16 activation rounding (intentional precision choice).
    ew = _default_elementwise_dtype()
    ref_weights = [weights[0]] + [w.astype(jnp.bfloat16).astype(jnp.float32)
                                  for w in weights[1:]]
    ref_biases = [b.astype(ew).astype(jnp.float32) for b in biases]

    # --- small batch: single full block, grid=(1,) ---------------------------
    batch = 8
    noise = jax.random.normal(nkey, (batch, input_dim), dtype=jnp.float32)
    out = jax.block_until_ready(basic_generator_forward(noise, weights, biases))
    ref = _reference_forward(noise, ref_weights, ref_biases)
    assert out.shape == (batch, output_dim)
    assert jnp.allclose(out, ref, atol=3e-4, rtol=3e-2), (
        float(jnp.max(jnp.abs(out - ref))))

    # --- larger batch: tiled pipelined path, even grid (tile=256, grid=(2,)) -
    batch2 = 512
    noise2 = jax.random.normal(jax.random.PRNGKey(1), (batch2, input_dim),
                               dtype=jnp.float32)
    out2 = jax.block_until_ready(
        basic_generator_forward(noise2, weights, biases))
    ref2 = _reference_forward(noise2, ref_weights, ref_biases)
    assert out2.shape == (batch2, output_dim)
    assert jnp.allclose(out2, ref2, atol=3e-4, rtol=3e-2), (
        float(jnp.max(jnp.abs(out2 - ref2))))

    print("KERNEL_OK")
</pallas_src>

<mosaic_0001>
module attributes {stable_mosaic.version = 11 : i64} {
  func.func @probe_kernel(%arg0: i32, %arg1: memref<8x128xf32, #tpu.memory_space<vmem>>, %arg2: memref<8x128xf32, #tpu.memory_space<vmem>>) attributes {dimension_semantics = [#tpu.dimension_semantics<arbitrary>], iteration_bounds = array<i64: 2>, scalar_prefetch = 0 : i64, scratch_operands = 0 : i64, tpu.core_type = #tpu.core_type<tc>, window_params = [{pipeline_mode = #tpu.pipeline_mode<synchronous>, transform_indices = @transform_0, window_bounds = array<i64: 8, 128>}, {transform_indices = @transform_1, window_bounds = array<i64: 8, 128>}]} {
    %c0 = arith.constant 0 : index
    %c0_0 = arith.constant 0 : index
    %0 = vector.load %arg1[%c0, %c0_0] : memref<8x128xf32, #tpu.memory_space<vmem>>, vector<8x128xf32>
    %c0_1 = arith.constant 0 : index
    %c0_2 = arith.constant 0 : index
    %1 = vector.load %arg2[%c0_1, %c0_2] : memref<8x128xf32, #tpu.memory_space<vmem>>, vector<8x128xf32>
    tpu.vector_store %arg2[%c0_1, %c0_2], %0 {strides = array<i32>} : memref<8x128xf32, #tpu.memory_space<vmem>>, vector<8x128xf32>,
    return
  }
  func.func @transform_0(%arg0: i32) -> (i32, i32) {
    %c0_i32 = arith.constant 0 : i32
    %c0_i32_0 = arith.constant 0 : i32
    %c0_i32_1 = arith.constant 0 : i32
    return %c0_i32, %c0_i32_0 : i32, i32
  }
  func.func @transform_1(%arg0: i32) -> (i32, i32) {
    %c0_i32 = arith.constant 0 : i32
    %c0_i32_0 = arith.constant 0 : i32
    return %arg0, %c0_i32 : i32, i32
  }
}

module attributes {stable_mosaic.version = 11 : i64} {
  func.func @kernel(%arg0: i32, %arg1: memref<8x2xf32, #tpu.memory_space<vmem>>, %arg2: memref<2x512xf32, #tpu.memory_space<vmem>>, %arg3: memref<512x512xbf16, #tpu.memory_space<vmem>>, %arg4: memref<512x512xbf16, #tpu.memory_space<vmem>>, %arg5: memref<512x128xbf16, #tpu.memory_space<vmem>>, %arg6: memref<1x1664xbf16, #tpu.memory_space<vmem>>, %arg7: memref<8x2xf32, #tpu.memory_space<vmem>>) attributes {dimension_semantics = [#tpu.dimension_semantics<parallel>], iteration_bounds = array<i64: 1>, scalar_prefetch = 0 : i64, scratch_operands = 0 : i64, tpu.core_type = #tpu.core_type<tc>, window_params = [{transform_indices = @transform_0, window_bounds = array<i64: 8, 2>}, {pipeline_mode = #tpu.pipeline_mode<synchronous>, transform_indices = @transform_1, window_bounds = array<i64: 2, 512>}, {pipeline_mode = #tpu.pipeline_mode<synchronous>, transform_indices = @transform_2, window_bounds = array<i64: 512, 512>}, {pipeline_mode = #tpu.pipeline_mode<synchronous>, transform_indices = @transform_3, window_bounds = array<i64: 512, 512>}, {pipeline_mode = #tpu.pipeline_mode<synchronous>, transform_indices = @transform_4, window_bounds = array<i64: 512, 128>}, {pipeline_mode = #tpu.pipeline_mode<synchronous>, transform_indices = @transform_5, window_bounds = array<i64: 1, 1664>}, {transform_indices = @transform_6, window_bounds = array<i64: 8, 2>}]} {
    %c0 = arith.constant 0 : index
    %c0_0 = arith.constant 0 : index
    %0 = vector.load %arg1[%c0, %c0_0] : memref<8x2xf32, #tpu.memory_space<vmem>>, vector<8x2xf32>
    %c0_1 = arith.constant 0 : index
    %c0_2 = arith.constant 0 : index
    %1 = vector.load %arg6[%c0_1, %c0_2] : memref<1x1664xbf16, #tpu.memory_space<vmem>>, vector<1x512xbf16>
    %c0_3 = arith.constant 0 : index
    %c0_4 = arith.constant 0 : index
    %2 = vector.load %arg2[%c0_3, %c0_4] : memref<2x512xf32, #tpu.memory_space<vmem>>, vector<2x512xf32>
    %3 = vector.extract_strided_slice %0 {offsets = [0, 0], sizes = [8, 1], strides = [1, 1]} : vector<8x2xf32> to vector<8x1xf32>
    %4 = vector.extract_strided_slice %2 {offsets = [0, 0], sizes = [1, 512], strides = [1, 1]} : vector<2x512xf32> to vector<1x512xf32>
    %5 = vector.broadcast %3 : vector<8x1xf32> to vector<8x512xf32>
    %6 = vector.broadcast %4 : vector<1x512xf32> to vector<8x512xf32>
    %7 = arith.mulf %5, %6 : vector<8x512xf32>
    %8 = vector.extract_strided_slice %0 {offsets = [0, 1], sizes = [8, 1], strides = [1, 1]} : vector<8x2xf32> to vector<8x1xf32>
    %9 = vector.extract_strided_slice %2 {offsets = [1, 0], sizes = [1, 512], strides = [1, 1]} : vector<2x512xf32> to vector<1x512xf32>
    %10 = vector.broadcast %8 : vector<8x1xf32> to vector<8x512xf32>
    %11 = vector.broadcast %9 : vector<1x512xf32> to vector<8x512xf32>
    %12 = arith.mulf %10, %11 : vector<8x512xf32>
    %13 = arith.addf %7, %12 : vector<8x512xf32>
    %14 = arith.extf %1 : vector<1x512xbf16> to vector<1x512xf32>
    %15 = vector.broadcast %14 : vector<1x512xf32> to vector<8x512xf32>
    %16 = arith.addf %13, %15 : vector<8x512xf32>
    %cst = arith.constant 0.000000e+00 : f32
    %17 = vector.broadcast %cst : f32 to vector<8x512xf32>
    %18 = arith.maximumf %16, %17 : vector<8x512xf32>
    %19 = arith.truncf %18 : vector<8x512xf32> to vector<8x512xbf16>
    %c0_5 = arith.constant 0 : index
    %c512 = arith.constant 512 : index
    %20 = vector.load %arg6[%c0_5, %c512] : memref<1x1664xbf16, #tpu.memory_space<vmem>>, vector<1x512xbf16>
    %c0_6 = arith.constant 0 : index
    %c0_7 = arith.constant 0 : index
    %21 = vector.load %arg3[%c0_6, %c0_7] : memref<512x512xbf16, #tpu.memory_space<vmem>>, vector<512x512xbf16>
    %cst_8 = arith.constant dense<0.000000e+00> : vector<8x512xf32>
    %22 = tpu.matmul %19, %21, %cst_8 {dimension_numbers = #tpu.dot_dimension_numbers<[1], [0], [0], [1], [0, 0, 1, 1], [], []>} : vector<8x512xbf16>, vector<512x512xbf16>, vector<8x512xf32> -> vector<8x512xf32>
    %23 = arith.truncf %22 : vector<8x512xf32> to vector<8x512xbf16>
    %24 = vector.broadcast %20 : vector<1x512xbf16> to vector<8x512xbf16>
    %25 = arith.addf %23, %24 : vector<8x512xbf16>
    %cst_9 = arith.constant 0.000000e+00 : bf16
    %26 = vector.broadcast %cst_9 : bf16 to vector<8x512xbf16>
    %27 = arith.maximumf %25, %26 : vector<8x512xbf16>
    %c0_10 = arith.constant 0 : index
    %c1024 = arith.constant 1024 : index
    %28 = vector.load %arg6[%c0_10, %c1024] : memref<1x1664xbf16, #tpu.memory_space<vmem>>, vector<1x512xbf16>
    %c0_11 = arith.constant 0 : index
    %c0_12 = arith.constant 0 : index
    %29 = vector.load %arg4[%c0_11, %c0_12] : memref<512x512xbf16, #tpu.memory_space<vmem>>, vector<512x512xbf16>
    %cst_13 = arith.constant dense<0.000000e+00> : vector<8x512xf32>
    %30 = tpu.matmul %27, %29, %cst_13 {dimension_numbers = #tpu.dot_dimension_numbers<[1], [0], [0], [1], [0, 0, 1, 1], [], []>} : vector<8x512xbf16>, vector<512x512xbf16>, vector<8x512xf32> -> vector<8x512xf32>
    %31 = arith.truncf %30 : vector<8x512xf32> to vector<8x512xbf16>
    %32 = vector.broadcast %28 : vector<1x512xbf16> to vector<8x512xbf16>
    %33 = arith.addf %31, %32 : vector<8x512xbf16>
    %cst_14 = arith.constant 0.000000e+00 : bf16
    %34 = vector.broadcast %cst_14 : bf16 to vector<8x512xbf16>
    %35 = arith.maximumf %33, %34 : vector<8x512xbf16>
    %c0_15 = arith.constant 0 : index
    %c1536 = arith.constant 1536 : index
    %36 = vector.load %arg6[%c0_15, %c1536] : memref<1x1664xbf16, #tpu.memory_space<vmem>>, vector<1x128xbf16>
    %c0_16 = arith.constant 0 : index
    %c0_17 = arith.constant 0 : index
    %37 = vector.load %arg5[%c0_16, %c0_17] : memref<512x128xbf16, #tpu.memory_space<vmem>>, vector<512x128xbf16>
    %cst_18 = arith.constant dense<0.000000e+00> : vector<8x128xf32>
    %38 = tpu.matmul %35, %37, %cst_18 {dimension_numbers = #tpu.dot_dimension_numbers<[1], [0], [0], [1], [0, 0, 1, 1], [], []>} : vector<8x512xbf16>, vector<512x128xbf16>, vector<8x128xf32> -> vector<8x128xf32>
    %39 = arith.extf %36 : vector<1x128xbf16> to vector<1x128xf32>
    %40 = vector.broadcast %39 : vector<1x128xf32> to vector<8x128xf32>
    %41 = arith.addf %38, %40 : vector<8x128xf32>
    %42 = vector.extract_strided_slice %41 {offsets = [0, 0], sizes = [8, 2], strides = [1, 1]} : vector<8x128xf32> to vector<8x2xf32>
    %c0_19 = arith.constant 0 : index
    %c0_20 = arith.constant 0 : index
    %43 = vector.load %arg7[%c0_19, %c0_20] : memref<8x2xf32, #tpu.memory_space<vmem>>, vector<8x2xf32>
    tpu.vector_store %arg7[%c0_19, %c0_20], %42 {strides = array<i32>} : memref<8x2xf32, #tpu.memory_space<vmem>>, vector<8x2xf32>,
    return
  }
  func.func @transform_0(%arg0: i32) -> (i32, i32) {
    %c0_i32 = arith.constant 0 : i32
    %c0_i32_0 = arith.constant 0 : i32
    return %arg0, %c0_i32 : i32, i32
  }
  func.func @transform_1(%arg0: i32) -> (i32, i32) {
    %c0_i32 = arith.constant 0 : i32
    %c0_i32_0 = arith.constant 0 : i32
    %c0_i32_1 = arith.constant 0 : i32
    return %c0_i32, %c0_i32_0 : i32, i32
  }
  func.func @transform_2(%arg0: i32) -> (i32, i32) {
    %c0_i32 = arith.constant 0 : i32
    %c0_i32_0 = arith.constant 0 : i32
    %c0_i32_1 = arith.constant 0 : i32
    return %c0_i32, %c0_i32_0 : i32, i32
  }
  func.func @transform_3(%arg0: i32) -> (i32, i32) {
    %c0_i32 = arith.constant 0 : i32
    %c0_i32_0 = arith.constant 0 : i32
    %c0_i32_1 = arith.constant 0 : i32
    return %c0_i32, %c0_i32_0 : i32, i32
  }
  func.func @transform_4(%arg0: i32) -> (i32, i32) {
    %c0_i32 = arith.constant 0 : i32
    %c0_i32_0 = arith.constant 0 : i32
    %c0_i32_1 = arith.constant 0 : i32
    return %c0_i32, %c0_i32_0 : i32, i32
  }
  func.func @transform_5(%arg0: i32) -> (i32, i32) {
    %c0_i32 = arith.constant 0 : i32
    %c0_i32_0 = arith.constant 0 : i32
    %c0_i32_1 = arith.constant 0 : i32
    return %c0_i32, %c0_i32_0 : i32, i32
  }
  func.func @transform_6(%arg0: i32) -> (i32, i32) {
    %c0_i32 = arith.constant 0 : i32
    %c0_i32_0 = arith.constant 0 : i32
    return %arg0, %c0_i32 : i32, i32
  }
}

</mosaic_0001>

<bundles_post_ra>
// kernel: tpu_custom_call.1
= control target key start
LH: loop header
LB: loop body
LE: loop exit
PB: predicated region body
PF: predicated region fallthrough
CT: control target
= control target key end

     0   :  { %6 = vsyncpa [#allocation3], 0  ;;  %s453_s0 = inlined_call_operand.hbm [shape: f32[8,128], index: 0, kind: input, shape index: {}]   ;;  %s454_s1 = inlined_call_operand.hbm [shape: f32[16,128], index: 1, kind: output, shape index: {}]  }
   0x1   :  { %7 = vsyncpa [#allocation4], 0 }
   0x2   :  { %9 = vsyncpa [#allocation4 + $0x1], 0  ;;  %s347_s6 = smov 0   ;;  %s349_s7 = smov 0  }
   0x3   :  { %s351_s8 = smov 0   ;;  %s353_s9 = smov 0  }
   0x4 LB: > { %s368_s10 = sadd.s32 4294967295, %s333_s9   ;;  %s183_s11 = sadd.s32 4294967294, %s333_s9   ;;  %s333_s9 = sphi %s353_s9, %s462_s9   ;;  %s329_s8 = sphi %s351_s8, %s461_s8   ;;  %s325_s7 = sphi %s349_s7, %s460_s7   ;;  %s321_s6 = sphi %s347_s6, %s459_s6  }
   0x5   : > { %s372_s12 = sadd.s32 1, %s333_s9   ;;  %s43_s13 = sadd.s32 1, %s329_s8 }
   0x6   : > { %s40_s14 = ssub.s32 %s333_s9, %s372_s12  ;;  %p53_p0 = scmp.ne.s32.totalorder %s329_s8, %s325_s7 }
   0x7   : > { %p41_p1 = scmp.eq.s32.totalorder %s40_s14, 0  ;;  %p54_p2 = scmp.eq.s32.totalorder %s368_s10, 1 }
   0x8   : > { %p59_p3 = scmp.ne.s32.totalorder %s325_s7, %s321_s6  ;;  %p60_p4 = scmp.eq.s32.totalorder %s183_s11, 1 }
   0x9   : > { %s383_s15 = scalar_select %p41_p1, %s329_s8, %s43_s13  }
   0xa   : > { %p385_p5 = por %p54_p2, %p53_p0  ;;  %p389_p6 = por %p60_p4, %p59_p3 }
   0xb   : > { %p184_p7 = scmp.ge.s32.totalorder %s333_s9, 1  ;;  %p67_p8 = scmp.lt.s32.totalorder %s333_s9, 3 }
   0xc   : > { %s456_s17 = scalar_select %p389_p6, 1, 0 }
   0xd   : > { %p207_p9 = scmp.eq.s32.totalorder %s368_s10, 0  ;;  %p396_p10 = pnand %p184_p7, %p67_p8 }
   0xe   : > { %s335_s19 = smov [#allocation2]  }
   0xf   : > { %s80_s20 = sshll.u32 %s335_s19, 4  ;;  %p199_p11 = pneg %p396_p10  ;;  %s81_s20 = int_to_ptr.vmem [resolvable:$true] %s80_s20 }
  0x10   : > { %s254_s21 = scalar_lea.vmem %s81_s20, 128  ;;  %p262_p3 = scmp.lt.s32.totalorder %s81_s20, %s81_s20 }
  0x11   : > { %p200_p12 = pnand %p207_p9, %p199_p11  ;;  %p255_p0 = scmp.ne.s32.totalorder %s81_s20, %s254_s21 }
  0x12   : > { %p263_p4 = scmp.lt.s32.totalorder %s254_s21, %s254_s21 }
  0x13   : > { %p245_p13 = pneg %p200_p12 }
  0x14   : > { %p264_p6 = por %p263_p4, %p262_p3 }
  0x15   : > { %p257_p1 = pnand %p255_p0, %p245_p13 }
  0x17   : > { %p258_p2 = pneg %p257_p1 }
  0x19   : > { %p265_p7 = pnand %p264_p6, %p258_p2 }
  0x1b   : > { %268 = shalt.err (!%p265_p7)
}
  0x1c   : > { %202 = dma.hbm_to_vmem [thread:$0]  (!%p200_p12), %s453_s0, 128, %s81_s20, [#allocation3]  }
  0x1d   : > { %93 = sbr.rel (%p396_p10) target bundleno = 60 (0x3c), region = 24 }
  0x22   : > { %312 = dma.done.wait (%p207_p9), [#allocation3], 128  }
  0x23   : > { %314 = vsyncadd (%p207_p9), [#allocation3], 4294967168  ;;  %s105_s24 = sand.u32 1, %s325_s7   ;;  %s190_s28 = sshll.u32 %s368_s10, 7  ;;  %v108_v0 = vld [vmem:[#allocation2] sm:$0xff] }
  0x24   : > { %s188_s25 = sshll.u32 %s105_s24, 3  ;;  %s122_s2 = scalar_lea.hbm %s454_s1, %s190_s28 }
  0x25   : > { %s107_s26 = scalar_lea.vmem [#allocation5], %s188_s25  ;;  %s111_s3 = scalar_lea.sflag [#allocation4], %s105_s24 }
  0x26   : > { %s124_s27 = sshll.u32 %s107_s26, 4  ;;  %109 = vst [vmem:[%s107_s26] sm:$0xff] %v108_v0  ;;  %s336_s5 = smov [#allocation5]   ;;  %s415_s27 = int_to_ptr.vmem [resolvable:$true] %s124_s27 }
  0x27   : > { %s269_s4 = scalar_lea.vmem %s415_s27, 128  ;;  %s273_s11 = sshll.u32 %s336_s5, 4  ;;  %s274_s11 = int_to_ptr.vmem [resolvable:$false] %s273_s11 }
  0x28   : > { %p270_p6 = scmp.ne.s32.totalorder %s415_s27, %s269_s4  ;;  %s275_s10 = scalar_lea.vmem %s274_s11, 256 }
  0x29   : > { %p276_p10 = scmp.lt.s32.totalorder %s415_s27, %s274_s11  ;;  %p277_p11 = scmp.lt.s32.totalorder %s275_s10, %s269_s4 }
  0x2a   : > { %p271_p8 = pnand %p270_p6, %p385_p5 }
  0x2b   : > { %p278_p12 = por %p277_p11, %p276_p10 }
  0x2c   : > { %p272_p9 = pneg %p271_p8 }
  0x2e   : > { %p279_p13 = pnand %p278_p12, %p272_p9 }
  0x30   : > { %282 = shalt.err (!%p279_p13)
}
  0x31   : > { %s283_s13 = scalar_lea.hbm %s122_s2, 128  ;;  %s287_s19 = scalar_lea.hbm %s454_s1, 256 }
  0x32   : > { %p284_p0 = scmp.ne.s32.totalorder %s122_s2, %s283_s13  ;;  %p288_p3 = scmp.lt.s32.totalorder %s122_s2, %s454_s1 }
  0x33   : > { %p289_p4 = scmp.lt.s32.totalorder %s287_s19, %s283_s13 }
  0x34   : > { %p285_p1 = pnand %p284_p0, %p385_p5 }
  0x35   : > { %p290_p7 = por %p289_p4, %p288_p3 }
  0x36   : > { %p286_p2 = pneg %p285_p1 }
  0x38   : > { %p291_p6 = pnand %p290_p7, %p286_p2 }
  0x3a   : > { %294 = shalt.err (!%p291_p6)
}
  0x3b   : > { %197 = dma.vmem_to_hbm [thread:$0]  (%p385_p5), %s415_s27, 128, %s122_s2, %s111_s3  }
  0x3c PF: > { %p209_p8 = scmp.ge.s32.totalorder %s333_s9, 2  ;;  %s136_s22 = sand.u32 1, %s321_s6  }
  0x3d   : > { %p458_p9 = scmp.ne.s32.totalorder %s456_s17, 0  ;;  %s137_s23 = scalar_lea.sflag [#allocation4], %s136_s22 }
  0x3f   : > { %p204_p10 = pnand %p209_p8, %p458_p9 }
  0x41   : > { %p205_p11 = pneg %p204_p10 }
  0x43   : > { %316 = dma.done.wait (%p205_p11), %s137_s23, 128  }
  0x44   : > { %318 = vsyncadd (%p205_p11), %s137_s23, 4294967168  ;;  %p12_p12 = scmp.ge.s32.totalorder %s372_s12, 4   ;;  %s459_s6 = smov %s325_s7 }
  0x45   : > { %s460_s7 = smov %s329_s8  ;;  %s461_s8 = smov %s383_s15 }
  0x46   : > { %s462_s9 = smov %s372_s12  ;;  %14 = sbr.rel (!%p12_p12) target bundleno = 4 (0x4), region = 61 }
  0x4b   :  { %142 = vsyncpa [#allocation3], 1 }
  0x4c   :  { %144 = vsyncpa [#allocation3 + $0x1], 1 }
  0x4d   :  { %145 = vsyncpa [#allocation4], 1 }
  0x4e   :  { %147 = vsyncpa [#allocation4 + $0x1], 1 }

// kernel: tpu_custom_call.1
= control target key start
LH: loop header
LB: loop body
LE: loop exit
PB: predicated region body
PF: predicated region fallthrough
CT: control target
= control target key end

     0   :  { %11 = vsyncpa [#allocation3], 0  ;;  %s3571_s0 = inlined_call_operand.vmem [shape: f32[8,2], index: 0, kind: input, shape index: {}]   ;;  %s3572_s1 = inlined_call_operand.hbm [shape: f32[2,512], index: 1, kind: input, shape index: {}]   ;;  %s3573_s2 = inlined_call_operand.hbm [shape: bf16[512,512], index: 2, kind: input, shape index: {}]   ;;  %s3574_s3 = inlined_call_operand.hbm [shape: bf16[512,512], index: 3, kind: input, shape index: {}]   ;;  %s3575_s4 = inlined_call_operand.hbm [shape: bf16[512,128], index: 4, kind: input, shape index: {}]   ;;  %s3576_s5 = inlined_call_operand.vmem [shape: bf16[1,1664], index: 5, kind: input, shape index: {}]   ;;  %s3577_s6 = inlined_call_operand.vmem [shape: f32[8,2], index: 6, kind: output, shape index: {}]  }
   0x1   :  { %12 = vsyncpa [#allocation5], 0 }
   0x2   :  { %13 = vsyncpa [#allocation8], 0  ;;  %s3420_s21 = smov [#allocation4]  }
   0x3   :  { %s31_s22 = sshll.u32 %s3420_s21, 4  ;;  %s32_s22 = int_to_ptr.vmem [resolvable:$true] %s31_s22 }
   0x4   :  { %s3342_s23 = scalar_lea.vmem %s32_s22, 16384  ;;  %p3347_p1 = scmp.lt.s32.totalorder %s32_s22, %s32_s22 }
   0x5   :  { %p3343_p0 = scmp.ne.s32.totalorder %s32_s22, %s3342_s23  ;;  %p3348_p2 = scmp.lt.s32.totalorder %s3342_s23, %s3342_s23 }
   0x7   :  { %p3349_p3 = por %p3348_p2, %p3347_p1 }
   0x9   :  { %p3350_p4 = pnand %p3349_p3, %p3343_p0 }
   0xb   :  { %3353 = shalt.err (!%p3350_p4)
}
   0xc   :  { %s3421_s24 = smov 256   ;;  %s3422_s25 = smov 16  }
   0xd   :  { %37 = dma.hbm_to_vmem [thread:$0]  %s3573_s2, 16384, %s32_s22, [#allocation5], %s3421_s24, %s3421_s24, %s3422_s25  }
   0xe   :  { %s3423_s28 = smov [#allocation2]   ;;  %s3424_s30 = smov [#allocation6]  }
   0xf   :  { %s22_s29 = sshll.u32 %s3423_s28, 4  ;;  %s43_s7 = sshll.u32 %s3424_s30, 4  ;;  %s23_s29 = int_to_ptr.vmem [resolvable:$true] %s22_s29  ;;  %s44_s7 = int_to_ptr.vmem [resolvable:$true] %s43_s7 }
  0x10   :  { %s3362_s8 = scalar_lea.vmem %s23_s29, 128  ;;  %p3367_p6 = scmp.lt.s32.totalorder %s23_s29, %s23_s29 }
  0x11   :  { %p3363_p5 = scmp.ne.s32.totalorder %s23_s29, %s3362_s8  ;;  %p3368_p7 = scmp.lt.s32.totalorder %s3362_s8, %s3362_s8 }
  0x13   :  { %p3369_p8 = por %p3368_p7, %p3367_p6 }
  0x15   :  { %p3370_p9 = pnand %p3369_p8, %p3363_p5 }
  0x17   :  { %3373 = shalt.err (!%p3370_p9)
}
  0x18   :  { %25 = dma.hbm_to_vmem [thread:$0]  %s3572_s1, 128, %s23_s29, [#allocation3]  }
  0x19   :  { %s3382_s11 = scalar_lea.vmem %s44_s7, 16384  ;;  %p3387_p11 = scmp.lt.s32.totalorder %s44_s7, %s44_s7 }
  0x1a   :  { %p3383_p10 = scmp.ne.s32.totalorder %s44_s7, %s3382_s11  ;;  %p3388_p12 = scmp.lt.s32.totalorder %s3382_s11, %s3382_s11 }
  0x1c   :  { %p3389_p13 = por %p3388_p12, %p3387_p11 }
  0x1e   :  { %p3390_p0 = pnand %p3389_p13, %p3383_p10 }
  0x20   :  { %3393 = shalt.err (!%p3390_p0)
}
  0x21   :  { %49 = dma.hbm_to_vmem [thread:$0]  %s3574_s3, 16384, %s44_s7, [#allocation5], %s3421_s24, %s3421_s24, %s3422_s25  }
  0x22   :  { %s3425_s13 = smov [#allocation7]  }
  0x23   :  { %s55_s14 = sshll.u32 %s3425_s13, 4  ;;  %s56_s14 = int_to_ptr.vmem [resolvable:$true] %s55_s14 }
  0x24   :  { %s3402_s15 = scalar_lea.vmem %s56_s14, 4096  ;;  %p3407_p2 = scmp.lt.s32.totalorder %s56_s14, %s56_s14 }
  0x25   :  { %p3403_p1 = scmp.ne.s32.totalorder %s56_s14, %s3402_s15  ;;  %p3408_p3 = scmp.lt.s32.totalorder %s3402_s15, %s3402_s15 }
  0x27   :  { %p3409_p4 = por %p3408_p3, %p3407_p2 }
  0x29   :  { %p3410_p5 = pnand %p3409_p4, %p3403_p1 }
  0x2b   :  { %3413 = shalt.err (!%p3410_p5)
}
  0x2c   :  { %s3426_s1 = smov 64   ;;  %s3427_s16 = smov 4  }
  0x2d   :  { %61 = dma.hbm_to_vmem [thread:$0]  %s3575_s4, 4096, %s56_s14, [#allocation8], %s3426_s1, %s3426_s1, %s3427_s16  }
  0x2e   :  { %3414 = dma.done.wait [#allocation3], 128  }
  0x2f   :  { %3415 = vsyncadd [#allocation3], 4294967168 }
  0x30   :  { %3416 = dma.done.wait [#allocation5], 32768  }
  0x31   :  { %3417 = vsyncadd [#allocation5], 4294934528 }
  0x32   :  { %3418 = dma.done.wait [#allocation8], 4096  }
  0x33   :  { %3419 = vsyncadd [#allocation8], 4294963200  ;;  %v3428_v0 = vmov 0   ;;  %v77_v1 = vld [vmem:[%s3571_s0] sm:$0xff]  ;;  %v2918_v2 = vld [vmem:[#allocation4 + $0xe4] ss:$16 sps:$4 sm:$0xff]  }
  0x34   :  { %2916 = vset.pattern.permute.xlu0 %v3428_v0  ;;  %v2920_v3 = vld [vmem:[#allocation4 + $0x2e4] ss:$16 sps:$4 sm:$0xff]   ;;  %v2922_v4 = vld [vmem:[#allocation4 + $0xe0] ss:$16 sps:$4 sm:$0xff]   ;;  %993 = vmatprep.subr.bf16.mxu0 %v2918_v2  ;;  %v3429_v8 = vmov 1   ;;  %vm2562_vm0 = vcmask 15360  }
  0x35   :  { %82 = vperm.xlu0 %2916, %v77_v1   ;;  %v2923_v5 = vld [vmem:[#allocation4 + $0x2e0] ss:$16 sps:$4 sm:$0xff]   ;;  %v2924_v6 = vld [vmem:[#allocation4 + $0xc4] ss:$16 sps:$4 sm:$0xff]   ;;  %1034 = vmatprep.subr.bf16.mxu1 %v2920_v3 }
  0x36   :  { %994 = vmatpush1.bf16.msra.mxu0 %v2922_v4  ;;  %v2926_v7 = vld [vmem:[#allocation4 + $0x2c4] ss:$16 sps:$4 sm:$0xff]   ;;  %1035 = vmatpush1.bf16.msra.mxu1 %v2923_v5  ;;  %v2928_v9 = vld [vmem:[#allocation4 + $0xc0] ss:$16 sps:$4 sm:$0xff]   ;;  %v3016_v4 = vld [vmem:[#allocation4 + $0xec] ss:$16 sps:$4 sm:$0xff]  }
  0x37   :  { %v2929_v10 = vld [vmem:[#allocation4 + $0x2c0] ss:$16 sps:$4 sm:$0xff]   ;;  %995 = vmatprep.subr.bf16.mxu0 %v2924_v6  ;;  %v2930_v11 = vld [vmem:[#allocation4 + $0xa4] ss:$16 sps:$4 sm:$0xff]   ;;  %1036 = vmatprep.subr.bf16.mxu1 %v2926_v7  ;;  %v3019_v5 = vld [vmem:[#allocation4 + $0x2ec] ss:$16 sps:$4 sm:$0xff]   ;;  %v86_v6 = vlaneseq }
  0x38   :  { %v2932_v12 = vld [vmem:[#allocation4 + $0x2a4] ss:$16 sps:$4 sm:$0xff]   ;;  %v2934_v13 = vld [vmem:[#allocation4 + $0xa0] ss:$16 sps:$4 sm:$0xff]  }
  0x39   :  { %2917 = vset.pattern.permute.xlu0 %v3429_v8  ;;  %v2935_v14 = vld [vmem:[#allocation4 + $0x2a0] ss:$16 sps:$4 sm:$0xff]   ;;  %v2936_v15 = vld [vmem:[#allocation4 + $0x84] ss:$16 sps:$4 sm:$0xff]   ;;  %v3482_v7 = vshrl.u32 %v86_v6, 7 }
  0x3a   :  { %127 = vperm.xlu0 %2917, %v77_v1   ;;  %996 = vmatpush1.bf16.msra.mxu0 %v2928_v9  ;;  %v2938_v16 = vld [vmem:[#allocation4 + $0x284] ss:$16 sps:$4 sm:$0xff]   ;;  %v2940_v17 = vld [vmem:[#allocation4 + $0x80] ss:$16 sps:$4 sm:$0xff]   ;;  %v78_v8 = vld [vmem:[%s3576_s5] sm:$0xf] }
  0x3b   :  { %1037 = vmatpush1.bf16.msra.mxu1 %v2929_v10  ;;  %997 = vmatprep.subr.bf16.mxu0 %v2930_v11  ;;  %v2941_v18 = vld [vmem:[#allocation4 + $0x280] ss:$16 sps:$4 sm:$0xff]   ;;  %v2942_v19 = vld [vmem:[#allocation4 + $0x64] ss:$16 sps:$4 sm:$0xff]   ;;  %v3488_v9 = vsub.s32 0, %v3482_v7  ;;  %v92_v10 = vsub.s32 2, %v3482_v7 }
  0x3c   :  { %1038 = vmatprep.subr.bf16.mxu1 %v2932_v12  ;;  %v2944_v20 = vld [vmem:[#allocation4 + $0x264] ss:$16 sps:$4 sm:$0xff]   ;;  %v2946_v21 = vld [vmem:[#allocation4 + $0x60] ss:$16 sps:$4 sm:$0xff]   ;;  %v96_v11 = vsub.s32 4, %v3482_v7  ;;  %v100_v12 = vsub.s32 6, %v3482_v7 }
  0x3d   :  { %v2947_v22 = vld [vmem:[#allocation4 + $0x260] ss:$16 sps:$4 sm:$0xff]   ;;  %v2948_v23 = vld [vmem:[#allocation4 + $0x44] ss:$16 sps:$4 sm:$0xff]  }
  0x3e   :  { %998 = vmatpush1.bf16.msra.mxu0 %v2934_v13  ;;  %v2950_v24 = vld [vmem:[#allocation4 + $0x244] ss:$16 sps:$4 sm:$0xff]   ;;  %v2952_v25 = vld [vmem:[#allocation4 + $0x40] ss:$16 sps:$4 sm:$0xff]   ;;  %v79_v13 = vld [vmem:[#allocation2] sm:$0xff] }
  0x3f   :  { %1039 = vmatpush1.bf16.msra.mxu1 %v2935_v14  ;;  %999 = vmatprep.subr.bf16.mxu0 %v2936_v15  ;;  %v2953_v26 = vld [vmem:[#allocation4 + $0x240] ss:$16 sps:$4 sm:$0xff]   ;;  %v2954_v27 = vld [vmem:[#allocation4 + $0x24] ss:$16 sps:$4 sm:$0xff]   ;;  %v132_v14 = vsub.s32 1, %v3482_v7  ;;  %v136_v15 = vsub.s32 3, %v3482_v7 }
  0x40   :  { %1040 = vmatprep.subr.bf16.mxu1 %v2938_v16  ;;  %v2956_v28 = vld [vmem:[#allocation4 + $0x224] ss:$16 sps:$4 sm:$0xff]   ;;  %v2958_v29 = vld [vmem:[#allocation4 + $0x20] ss:$16 sps:$4 sm:$0xff]   ;;  %v140_v16 = vsub.s32 5, %v3482_v7 }
  0x41   :  { %v2959_v30 = vld [vmem:[#allocation4 + $0x220] ss:$16 sps:$4 sm:$0xff]   ;;  %v2960_v31 = vld [vmem:[#allocation4 + $0x4] ss:$16 sps:$4 sm:$0xff]  }
  0x42   :  { %1000 = vmatpush1.bf16.msra.mxu0 %v2940_v17  ;;  %v2962_v32 = vld [vmem:[#allocation4 + $0x204] ss:$16 sps:$4 sm:$0xff]   ;;  %v2964_v33 = vld [vmem:[#allocation4] ss:$16 sps:$4 sm:$0xff]   ;;  %v144_v17 = vsub.s32 7, %v3482_v7 }
  0x43   :  { %1041 = vmatpush1.bf16.msra.mxu1 %v2941_v18  ;;  %1001 = vmatprep.subr.bf16.mxu0 %v2942_v19  ;;  %v2965_v34 = vld [vmem:[#allocation4 + $0x200] ss:$16 sps:$4 sm:$0xff]   ;;  %v2966_v35 = vld [vmem:[#allocation4 + $0x1e4] ss:$16 sps:$4 sm:$0xff]   ;;  %v174_v18 = vunpack.c.l.bf16 %v78_v8  ;;  %v89_v19 = vrot.slane %v79_v13, %v3488_v9 }
  0x44   :  { %1042 = vmatprep.subr.bf16.mxu1 %v2944_v20  ;;  %v2968_v36 = vld [vmem:[#allocation4 + $0x3e4] ss:$16 sps:$4 sm:$0xff]   ;;  %v2970_v37 = vld [vmem:[#allocation4 + $0x1e0] ss:$16 sps:$4 sm:$0xff]   ;;  %v93_v20 = vrot.slane %v79_v13, %v92_v10 }
  0x45   :  { %v2971_v38 = vld [vmem:[#allocation4 + $0x3e0] ss:$16 sps:$4 sm:$0xff]   ;;  %v2972_v39 = vld [vmem:[#allocation4 + $0x1c4] ss:$16 sps:$4 sm:$0xff]  }
  0x46   :  { %1002 = vmatpush1.bf16.msra.mxu0 %v2946_v21  ;;  %v2974_v40 = vld [vmem:[#allocation4 + $0x3c4] ss:$16 sps:$4 sm:$0xff]   ;;  %v2976_v41 = vld [vmem:[#allocation4 + $0x1c0] ss:$16 sps:$4 sm:$0xff]   ;;  %v97_v21 = vrot.slane %v79_v13, %v96_v11 }
  0x47   :  { %1043 = vmatpush1.bf16.msra.mxu1 %v2947_v22  ;;  %1003 = vmatprep.subr.bf16.mxu0 %v2948_v23  ;;  %v2977_v42 = vld [vmem:[#allocation4 + $0x3c0] ss:$16 sps:$4 sm:$0xff]   ;;  %v2978_v43 = vld [vmem:[#allocation4 + $0x1a4] ss:$16 sps:$4 sm:$0xff]   ;;  %v101_v22 = vrot.slane %v79_v13, %v100_v12  ;;  %v133_v23 = vrot.slane %v79_v13, %v132_v14 }
  0x48   :  { %1044 = vmatprep.subr.bf16.mxu1 %v2950_v24  ;;  %v2980_v44 = vld [vmem:[#allocation4 + $0x3a4] ss:$16 sps:$4 sm:$0xff]   ;;  %v2982_v45 = vld [vmem:[#allocation4 + $0x1a0] ss:$16 sps:$4 sm:$0xff]   ;;  %v137_v24 = vrot.slane %v79_v13, %v136_v15  ;;  %v3031_v15 = vld [vmem:[#allocation4 + $0x2ac] ss:$16 sps:$4 sm:$0xff]  }
  0x49   :  { %v2983_v46 = vld [vmem:[#allocation4 + $0x3a0] ss:$16 sps:$4 sm:$0xff]   ;;  %v2984_v47 = vld [vmem:[#allocation4 + $0x184] ss:$16 sps:$4 sm:$0xff]  }
  0x4a   :  { %1004 = vmatpush1.bf16.msra.mxu0 %v2952_v25  ;;  %v2986_v48 = vld [vmem:[#allocation4 + $0x384] ss:$16 sps:$4 sm:$0xff]   ;;  %v2988_v49 = vld [vmem:[#allocation4 + $0x180] ss:$16 sps:$4 sm:$0xff]   ;;  %v141_v25 = vrot.slane %v79_v13, %v140_v16  ;;  %v3026_v16 = vld [vmem:[#allocation4 + $0xa8] ss:$16 sps:$4 sm:$0xff]  }
  0x4b   :  { %1045 = vmatpush1.bf16.msra.mxu1 %v2953_v26  ;;  %1005 = vmatprep.subr.bf16.mxu0 %v2954_v27  ;;  %v2989_v50 = vld [vmem:[#allocation4 + $0x380] ss:$16 sps:$4 sm:$0xff]   ;;  %v2990_v51 = vld [vmem:[#allocation4 + $0x164] ss:$16 sps:$4 sm:$0xff]   ;;  %v145_v26 = vrot.slane %v79_v13, %v144_v17  ;;  %v3023_v13 = vld [vmem:[#allocation4 + $0x2c8] ss:$16 sps:$4 sm:$0xff]  }
  0x4c   :  { %1046 = vmatprep.subr.bf16.mxu1 %v2956_v28  ;;  %v2992_v52 = vld [vmem:[#allocation4 + $0x364] ss:$16 sps:$4 sm:$0xff]   ;;  %v2994_v53 = vld [vmem:[#allocation4 + $0x160] ss:$16 sps:$4 sm:$0xff]   ;;  %v183_v28 = vrot.slane %v174_v18, %v92_v10  ;;  %v3022_v10 = vld [vmem:[#allocation4 + $0xcc] ss:$16 sps:$4 sm:$0xff]  }
  0x4d   :  { %v2995_v54 = vld [vmem:[#allocation4 + $0x360] ss:$16 sps:$4 sm:$0xff]   ;;  %v2996_v55 = vld [vmem:[#allocation4 + $0x144] ss:$16 sps:$4 sm:$0xff]   ;;  %v3029_v17 = vld [vmem:[#allocation4 + $0x2a8] ss:$16 sps:$4 sm:$0xff]  }
  0x4e   :  { %1006 = vmatpush1.bf16.msra.mxu0 %v2958_v29  ;;  %v2998_v56 = vld [vmem:[#allocation4 + $0x344] ss:$16 sps:$4 sm:$0xff]   ;;  %v3000_v57 = vld [vmem:[#allocation4 + $0x140] ss:$16 sps:$4 sm:$0xff]   ;;  %v191_v29 = vrot.slane %v174_v18, %v100_v12  ;;  %v3020_v12 = vld [vmem:[#allocation4 + $0xc8] ss:$16 sps:$4 sm:$0xff]  }
  0x4f   :  { %1047 = vmatpush1.bf16.msra.mxu1 %v2959_v30  ;;  %1007 = vmatprep.subr.bf16.mxu0 %v2960_v31  ;;  %v3001_v58 = vld [vmem:[#allocation4 + $0x340] ss:$16 sps:$4 sm:$0xff]   ;;  %v3002_v59 = vld [vmem:[#allocation4 + $0x124] ss:$16 sps:$4 sm:$0xff]   ;;  %v179_v30 = vrot.slane %v174_v18, %v3488_v9  ;;  %v187_v31 = vrot.slane %v174_v18, %v96_v11  ;;  %v3025_v11 = vld [vmem:[#allocation4 + $0x2cc] ss:$16 sps:$4 sm:$0xff]  }
  0x50   :  { %1048 = vmatprep.subr.bf16.mxu1 %v2962_v32  ;;  %v3004_v60 = vld [vmem:[#allocation4 + $0x324] ss:$16 sps:$4 sm:$0xff]   ;;  %v3006_v61 = vld [vmem:[#allocation4 + $0x120] ss:$16 sps:$4 sm:$0xff]   ;;  %v109_v32 = vrot.slane %v89_v19, %v3488_v9  ;;  %v3034_v18 = vld [vmem:[#allocation4 + $0x8c] ss:$16 sps:$4 sm:$0xff]  }
  0x51   :  { %v3007_v62 = vld [vmem:[#allocation4 + $0x320] ss:$16 sps:$4 sm:$0xff]   ;;  %v3008_v63 = vld [vmem:[#allocation4 + $0x104] ss:$16 sps:$4 sm:$0xff]   ;;  %v3037_v19 = vld [vmem:[#allocation4 + $0x28c] ss:$16 sps:$4 sm:$0xff]  }
  0x52   :  { %1008 = vmatpush1.bf16.msra.mxu0 %v2964_v33  ;;  %v3010_v1 = vld [vmem:[#allocation4 + $0x304] ss:$16 sps:$4 sm:$0xff]   ;;  %v3012_v2 = vld [vmem:[#allocation4 + $0x100] ss:$16 sps:$4 sm:$0xff]   ;;  %v113_v33 = vrot.slane %v93_v20, %v3488_v9  ;;  %v3032_v20 = vld [vmem:[#allocation4 + $0x88] ss:$16 sps:$4 sm:$0xff]  }
  0x53   :  { %1049 = vmatpush1.bf16.msra.mxu1 %v2965_v34  ;;  %1009 = vmatprep.subr.bf16.mxu0 %v2966_v35  ;;  %v3013_v3 = vld [vmem:[#allocation4 + $0x300] ss:$16 sps:$4 sm:$0xff]   ;;  %v117_v34 = vrot.slane %v97_v21, %v3488_v9  ;;  %v121_v35 = vrot.slane %v101_v22, %v3488_v9  ;;  %v3035_v21 = vld [vmem:[#allocation4 + $0x288] ss:$16 sps:$4 sm:$0xff]   ;;  %v3040_v22 = vld [vmem:[#allocation4 + $0x6c] ss:$16 sps:$4 sm:$0xff]  }
  0x54   :  { %1050 = vmatprep.subr.bf16.mxu1 %v2968_v36  ;;  %v153_v36 = vrot.slane %v133_v23, %v132_v14  ;;  %v3043_v23 = vld [vmem:[#allocation4 + $0x26c] ss:$16 sps:$4 sm:$0xff]  }
  0x56   :  { %1010 = vmatpush2.bf16.msra.mxu0 %v2970_v37  ;;  %v157_v37 = vrot.slane %v137_v24, %v132_v14  ;;  %v3038_v24 = vld [vmem:[#allocation4 + $0x68] ss:$16 sps:$4 sm:$0xff]  }
  0x57   :  { %1051 = vmatpush2.bf16.msra.mxu1 %v2971_v38  ;;  %1011 = vmatprep.subr.bf16.mxu0 %v2972_v39  ;;  %v161_v38 = vrot.slane %v141_v25, %v132_v14  ;;  %v165_v39 = vrot.slane %v145_v26, %v132_v14  ;;  %v3028_v14 = vld [vmem:[#allocation4 + $0xac] ss:$16 sps:$4 sm:$0xff]   ;;  %v3041_v25 = vld [vmem:[#allocation4 + $0x268] ss:$16 sps:$4 sm:$0xff]  }
  0x58   :  { %1052 = vmatprep.subr.bf16.mxu1 %v2974_v40  ;;  %v203_v40 = vrot.slane %v183_v28, %v3488_v9  ;;  %v3046_v26 = vld [vmem:[#allocation4 + $0x4c] ss:$16 sps:$4 sm:$0xff]   ;;  %v3044_v28 = vld [vmem:[#allocation4 + $0x48] ss:$16 sps:$4 sm:$0xff]  }
  0x5a   :  { %1012 = vmatpush2.bf16.msra.mxu0 %v2976_v41  ;;  %v211_v41 = vrot.slane %v191_v29, %v3488_v9  ;;  %v3047_v29 = vld [vmem:[#allocation4 + $0x248] ss:$16 sps:$4 sm:$0xff]  }
  0x5b   :  { %1053 = vmatpush2.bf16.msra.mxu1 %v2977_v42  ;;  %1013 = vmatprep.subr.bf16.mxu0 %v2978_v43  ;;  %v199_v42 = vrot.slane %v179_v30, %v3488_v9  ;;  %v207_v43 = vrot.slane %v187_v31, %v3488_v9  ;;  %v3052_v30 = vld [vmem:[#allocation4 + $0x2c] ss:$16 sps:$4 sm:$0xff]  }
  0x5c   :  { %1054 = vmatprep.subr.bf16.mxu1 %v2980_v44  ;;  %v3055_v31 = vld [vmem:[#allocation4 + $0x22c] ss:$16 sps:$4 sm:$0xff]  }
  0x5e   :  { %1014 = vmatpush2.bf16.msra.mxu0 %v2982_v45 }
  0x5f   :  { %1055 = vmatpush2.bf16.msra.mxu1 %v2983_v46  ;;  %1015 = vmatprep.subr.bf16.mxu0 %v2984_v47 }
  0x60   :  { %1056 = vmatprep.subr.bf16.mxu1 %v2986_v48 }
  0x62   :  { %1016 = vmatpush2.bf16.msra.mxu0 %v2988_v49 }
  0x63   :  { %1057 = vmatpush2.bf16.msra.mxu1 %v2989_v50  ;;  %1017 = vmatprep.subr.bf16.mxu0 %v2990_v51 }
  0x64   :  { %1058 = vmatprep.subr.bf16.mxu1 %v2992_v52 }
  0x66   :  { %1018 = vmatpush2.bf16.msra.mxu0 %v2994_v53 }
  0x67   :  { %1059 = vmatpush2.bf16.msra.mxu1 %v2995_v54  ;;  %1019 = vmatprep.subr.bf16.mxu0 %v2996_v55 }
  0x68   :  { %1060 = vmatprep.subr.bf16.mxu1 %v2998_v56 }
  0x6a   :  { %1020 = vmatpush2.bf16.msra.mxu0 %v3000_v57 }
  0x6b   :  { %1061 = vmatpush2.bf16.msra.mxu1 %v3001_v58  ;;  %1021 = vmatprep.subr.bf16.mxu0 %v3002_v59 }
  0x6c   :  { %1062 = vmatprep.subr.bf16.mxu1 %v3004_v60 }
  0x6e   :  { %1022 = vmatpush2.bf16.msra.mxu0 %v3006_v61 }
  0x6f   :  { %1063 = vmatpush2.bf16.msra.mxu1 %v3007_v62  ;;  %1023 = vmatprep.subr.bf16.mxu0 %v3008_v63  ;;  %v3014_v63 = vld [vmem:[#allocation4 + $0xe8] ss:$16 sps:$4 sm:$0xff]  }
  0x70   :  { %1064 = vmatprep.subr.bf16.mxu1 %v3010_v1  ;;  %v3017_v1 = vld [vmem:[#allocation4 + $0x2e8] ss:$16 sps:$4 sm:$0xff]  }
  0x72   :  { %1024 = vmatpush2.bf16.msra.mxu0 %v3012_v2 }
  0x73   :  { %1065 = vmatpush2.bf16.msra.mxu1 %v3013_v3  ;;  %1075 = vmatprep.subr.bf16.mxu0 %v3016_v4 }
  0x74   :  { %1116 = vmatprep.subr.bf16.mxu1 %v3019_v5 }
  0xb0   :  { %v83_v27 = vpop.permute.xlu0 %82 }
  0xb1   :  { %v122_v44 = vmul.f32 %v109_v32, %v83_v27  ;;  %v123_v45 = vmul.f32 %v113_v33, %v83_v27  ;;  %v124_v46 = vmul.f32 %v117_v34, %v83_v27  ;;  %v125_v47 = vmul.f32 %v121_v35, %v83_v27  ;;  %v3049_v27 = vld [vmem:[#allocation4 + $0x24c] ss:$16 sps:$4 sm:$0xff]   ;;  %v3050_v32 = vld [vmem:[#allocation4 + $0x28] ss:$16 sps:$4 sm:$0xff]  }
  0xb2   :  { %v3053_v33 = vld [vmem:[#allocation4 + $0x228] ss:$16 sps:$4 sm:$0xff]   ;;  %v3058_v34 = vld [vmem:[#allocation4 + $0xc] ss:$16 sps:$4 sm:$0xff]  }
  0xb3   :  { %v3061_v35 = vld [vmem:[#allocation4 + $0x20c] ss:$16 sps:$4 sm:$0xff]  }
  0xb5   :  { %v128_v48 = vpop.permute.xlu0 %127 }
  0xb6   :  { %v166_v49 = vmul.f32 %v153_v36, %v128_v48  ;;  %v167_v50 = vmul.f32 %v157_v37, %v128_v48  ;;  %v168_v51 = vmul.f32 %v161_v38, %v128_v48  ;;  %v169_v52 = vmul.f32 %v165_v39, %v128_v48  ;;  %v3056_v36 = vld [vmem:[#allocation4 + $0x8] ss:$16 sps:$4 sm:$0xff]   ;;  %v3064_v38 = vld [vmem:[#allocation4 + $0x1ec] ss:$16 sps:$4 sm:$0xff]  }
  0xb7   :  { %v3059_v37 = vld [vmem:[#allocation4 + $0x208] ss:$16 sps:$4 sm:$0xff]   ;;  %v3067_v39 = vld [vmem:[#allocation4 + $0x3ec] ss:$16 sps:$4 sm:$0xff]  }
  0xb8   :  { %v170_v53 = vadd.f32 %v166_v49, %v122_v44  ;;  %v172_v54 = vadd.f32 %v168_v51, %v124_v46  ;;  %v171_v55 = vadd.f32 %v167_v50, %v123_v45  ;;  %v173_v56 = vadd.f32 %v169_v52, %v125_v47  ;;  %v3068_v44 = vld [vmem:[#allocation4 + $0x1c8] ss:$16 sps:$4 sm:$0xff]   ;;  %v3076_v46 = vld [vmem:[#allocation4 + $0x1ac] ss:$16 sps:$4 sm:$0xff]  }
  0xb9   :  { %v3071_v45 = vld [vmem:[#allocation4 + $0x3c8] ss:$16 sps:$4 sm:$0xff]   ;;  %v3079_v47 = vld [vmem:[#allocation4 + $0x3ac] ss:$16 sps:$4 sm:$0xff]  }
  0xba   :  { %v213_v57 = vadd.f32 %v203_v40, %v171_v55  ;;  %v215_v58 = vadd.f32 %v211_v41, %v173_v56  ;;  %v212_v59 = vadd.f32 %v199_v42, %v170_v53  ;;  %v214_v60 = vadd.f32 %v207_v43, %v172_v54  ;;  %v3062_v40 = vld [vmem:[#allocation4 + $0x1e8] ss:$16 sps:$4 sm:$0xff]   ;;  %v3070_v42 = vld [vmem:[#allocation4 + $0x1cc] ss:$16 sps:$4 sm:$0xff]  }
  0xbb   :  { %v3065_v41 = vld [vmem:[#allocation4 + $0x3e8] ss:$16 sps:$4 sm:$0xff]   ;;  %v3073_v43 = vld [vmem:[#allocation4 + $0x3cc] ss:$16 sps:$4 sm:$0xff]  }
  0xbc   :  { %v217_v61 = vmax.f32 %v213_v57, 0.0  ;;  %v219_v62 = vmax.f32 %v215_v58, 0.0  ;;  %v216_v2 = vmax.f32 %v212_v59, 0.0  ;;  %v218_v3 = vmax.f32 %v214_v60, 0.0  ;;  %v3074_v48 = vld [vmem:[#allocation4 + $0x1a8] ss:$16 sps:$4 sm:$0xff]  }
  0xbd   :  { %v3077_v49 = vld [vmem:[#allocation4 + $0x3a8] ss:$16 sps:$4 sm:$0xff]   ;;  %v3082_v50 = vld [vmem:[#allocation4 + $0x18c] ss:$16 sps:$4 sm:$0xff]  }
  0xbe   :  { %v221_v4 = vpack.c.bf16 %v217_v61, %v217_v61  ;;  %v223_v5 = vpack.c.bf16 %v219_v62, %v219_v62  ;;  %v3507_v6 = vpack.c.bf16 %v216_v2, %v216_v2  ;;  %v3509_v8 = vpack.c.bf16 %v218_v3, %v218_v3  ;;  %v3085_v51 = vld [vmem:[#allocation4 + $0x38c] ss:$16 sps:$4 sm:$0xff]   ;;  %v3080_v52 = vld [vmem:[#allocation4 + $0x188] ss:$16 sps:$4 sm:$0xff]  }
  0xbf   :  { %v3083_v53 = vld [vmem:[#allocation4 + $0x388] ss:$16 sps:$4 sm:$0xff]   ;;  %v3088_v54 = vld [vmem:[#allocation4 + $0x16c] ss:$16 sps:$4 sm:$0xff]  }
  0xc0   :  { %1025 = vmatprep.mubr.bf16.mxu0 %v221_v4  ;;  %1066 = vmatprep.mubr.bf16.mxu1 %v223_v5  ;;  %v3091_v55 = vld [vmem:[#allocation4 + $0x36c] ss:$16 sps:$4 sm:$0xff]   ;;  %v3086_v56 = vld [vmem:[#allocation4 + $0x168] ss:$16 sps:$4 sm:$0xff]  }
  0xc1   :  { %1026 = vmatmul.mubr.bf16.vlgmr.msra.gmra.mxu0 %v3507_v6  ;;  %1067 = vmatmul.mubr.bf16.vlgmr.msra.gmra.mxu1 %v3509_v8  ;;  %v3089_v57 = vld [vmem:[#allocation4 + $0x368] ss:$16 sps:$4 sm:$0xff]   ;;  %v3094_v58 = vld [vmem:[#allocation4 + $0x14c] ss:$16 sps:$4 sm:$0xff]  }
  0xc2   :  { %1076 = vmatpush1.bf16.msra.mxu0 %v3014_v63  ;;  %1117 = vmatpush1.bf16.msra.mxu1 %v3017_v1  ;;  %v3097_v59 = vld [vmem:[#allocation4 + $0x34c] ss:$16 sps:$4 sm:$0xff]   ;;  %v3092_v60 = vld [vmem:[#allocation4 + $0x148] ss:$16 sps:$4 sm:$0xff]  }
  0xc3   :  { %1107 = vmatprep.mubr.bf16.mxu0 %v221_v4  ;;  %1148 = vmatprep.mubr.bf16.mxu1 %v223_v5  ;;  %v3095_v61 = vld [vmem:[#allocation4 + $0x348] ss:$16 sps:$4 sm:$0xff]   ;;  %v3100_v62 = vld [vmem:[#allocation4 + $0x12c] ss:$16 sps:$4 sm:$0xff]  }
  0xc4   :  { %1077 = vmatprep.subr.bf16.mxu0 %v3022_v10  ;;  %1118 = vmatprep.subr.bf16.mxu1 %v3025_v11  ;;  %v3103_v63 = vld [vmem:[#allocation4 + $0x32c] ss:$16 sps:$4 sm:$0xff]   ;;  %v3098_v1 = vld [vmem:[#allocation4 + $0x128] ss:$16 sps:$4 sm:$0xff]   ;;  %v3112_v11 = vld [vmem:[#allocation6 + $0xe4] ss:$16 sps:$4 sm:$0xff]  }
  0xc5   :  { %v3101_v2 = vld [vmem:[#allocation4 + $0x328] ss:$16 sps:$4 sm:$0xff]   ;;  %v3106_v3 = vld [vmem:[#allocation4 + $0x10c] ss:$16 sps:$4 sm:$0xff]  }
  0xc6   :  { %1078 = vmatpush1.bf16.msra.mxu0 %v3020_v12  ;;  %1119 = vmatpush1.bf16.msra.mxu1 %v3023_v13  ;;  %v3109_v4 = vld [vmem:[#allocation4 + $0x30c] ss:$16 sps:$4 sm:$0xff]   ;;  %v3104_v5 = vld [vmem:[#allocation4 + $0x108] ss:$16 sps:$4 sm:$0xff]   ;;  %v3110_v12 = vld [vmem:[#allocation6 + $0xe0] ss:$16 sps:$4 sm:$0xff]  }
  0xc7   :  { %1079 = vmatprep.subr.bf16.mxu0 %v3028_v14  ;;  %1120 = vmatprep.subr.bf16.mxu1 %v3031_v15  ;;  %v3107_v10 = vld [vmem:[#allocation4 + $0x308] ss:$16 sps:$4 sm:$0xff]   ;;  %v3115_v13 = vld [vmem:[#allocation6 + $0xc4] ss:$16 sps:$4 sm:$0xff]   ;;  %v3113_v14 = vld [vmem:[#allocation6 + $0xc0] ss:$16 sps:$4 sm:$0xff]  }
  0xc8   :  { %v3118_v15 = vld [vmem:[#allocation6 + $0xa4] ss:$16 sps:$4 sm:$0xff]  }
  0xca   :  { %1080 = vmatpush1.bf16.msra.mxu0 %v3026_v16  ;;  %1121 = vmatpush1.bf16.msra.mxu1 %v3029_v17  ;;  %v3116_v16 = vld [vmem:[#allocation6 + $0xa0] ss:$16 sps:$4 sm:$0xff]   ;;  %v3121_v17 = vld [vmem:[#allocation6 + $0x84] ss:$16 sps:$4 sm:$0xff]  }
  0xcb   :  { %1081 = vmatprep.subr.bf16.mxu0 %v3034_v18  ;;  %1122 = vmatprep.subr.bf16.mxu1 %v3037_v19  ;;  %v3158_v18 = vld [vmem:[#allocation6 + $0x2e0] ss:$16 sps:$4 sm:$0xff]   ;;  %v3160_v19 = vld [vmem:[#allocation6 + $0x2e4] ss:$16 sps:$4 sm:$0xff]  }
  0xce   :  { %1082 = vmatpush1.bf16.msra.mxu0 %v3032_v20  ;;  %1123 = vmatpush1.bf16.msra.mxu1 %v3035_v21  ;;  %v3119_v20 = vld [vmem:[#allocation6 + $0x80] ss:$16 sps:$4 sm:$0xff]   ;;  %v3124_v21 = vld [vmem:[#allocation6 + $0x64] ss:$16 sps:$4 sm:$0xff]  }
  0xcf   :  { %1083 = vmatprep.subr.bf16.mxu0 %v3040_v22  ;;  %1124 = vmatprep.subr.bf16.mxu1 %v3043_v23  ;;  %v3164_v22 = vld [vmem:[#allocation6 + $0x2c0] ss:$16 sps:$4 sm:$0xff]   ;;  %v3127_v23 = vld [vmem:[#allocation6 + $0x44] ss:$16 sps:$4 sm:$0xff]  }
  0xd2   :  { %1084 = vmatpush1.bf16.msra.mxu0 %v3038_v24  ;;  %1125 = vmatpush1.bf16.msra.mxu1 %v3041_v25  ;;  %v3125_v24 = vld [vmem:[#allocation6 + $0x40] ss:$16 sps:$4 sm:$0xff]  }
  0xd3   :  { %1085 = vmatprep.subr.bf16.mxu0 %v3046_v26  ;;  %1126 = vmatprep.subr.bf16.mxu1 %v3049_v27  ;;  %v3170_v25 = vld [vmem:[#allocation6 + $0x2a0] ss:$16 sps:$4 sm:$0xff]   ;;  %v3172_v26 = vld [vmem:[#allocation6 + $0x2a4] ss:$16 sps:$4 sm:$0xff]  }
  0xd4   :  { %v3130_v27 = vld [vmem:[#allocation6 + $0x24] ss:$16 sps:$4 sm:$0xff]  }
  0xd6   :  { %1086 = vmatpush1.bf16.msra.mxu0 %v3044_v28  ;;  %1127 = vmatpush1.bf16.msra.mxu1 %v3047_v29  ;;  %v3128_v28 = vld [vmem:[#allocation6 + $0x20] ss:$16 sps:$4 sm:$0xff]  }
  0xd7   :  { %1087 = vmatprep.subr.bf16.mxu0 %v3052_v30  ;;  %1128 = vmatprep.subr.bf16.mxu1 %v3055_v31  ;;  %v3176_v29 = vld [vmem:[#allocation6 + $0x280] ss:$16 sps:$4 sm:$0xff]   ;;  %v3178_v30 = vld [vmem:[#allocation6 + $0x284] ss:$16 sps:$4 sm:$0xff]  }
  0xd8   :  { %v3133_v31 = vld [vmem:[#allocation6 + $0x4] ss:$16 sps:$4 sm:$0xff]  }
  0xda   :  { %1088 = vmatpush1.bf16.msra.mxu0 %v3050_v32  ;;  %1129 = vmatpush1.bf16.msra.mxu1 %v3053_v33  ;;  %v3131_v32 = vld [vmem:[#allocation6] ss:$16 sps:$4 sm:$0xff]  }
  0xdb   :  { %1089 = vmatprep.subr.bf16.mxu0 %v3058_v34  ;;  %1130 = vmatprep.subr.bf16.mxu1 %v3061_v35  ;;  %v3182_v33 = vld [vmem:[#allocation6 + $0x260] ss:$16 sps:$4 sm:$0xff]   ;;  %v3184_v34 = vld [vmem:[#allocation6 + $0x264] ss:$16 sps:$4 sm:$0xff]  }
  0xdc   :  { %v3136_v35 = vld [vmem:[#allocation6 + $0x1e4] ss:$16 sps:$4 sm:$0xff]  }
  0xde   :  { %1090 = vmatpush1.bf16.msra.mxu0 %v3056_v36  ;;  %1131 = vmatpush1.bf16.msra.mxu1 %v3059_v37  ;;  %v3134_v36 = vld [vmem:[#allocation6 + $0x1e0] ss:$16 sps:$4 sm:$0xff]  }
  0xdf   :  { %1091 = vmatprep.subr.bf16.mxu0 %v3064_v38  ;;  %1132 = vmatprep.subr.bf16.mxu1 %v3067_v39  ;;  %v3188_v37 = vld [vmem:[#allocation6 + $0x240] ss:$16 sps:$4 sm:$0xff]   ;;  %v3190_v38 = vld [vmem:[#allocation6 + $0x244] ss:$16 sps:$4 sm:$0xff]  }
  0xe0   :  { %v3139_v39 = vld [vmem:[#allocation6 + $0x1c4] ss:$16 sps:$4 sm:$0xff]  }
  0xe2   :  { %1092 = vmatpush2.bf16.msra.mxu0 %v3062_v40  ;;  %1133 = vmatpush2.bf16.msra.mxu1 %v3065_v41  ;;  %v3137_v40 = vld [vmem:[#allocation6 + $0x1c0] ss:$16 sps:$4 sm:$0xff]  }
  0xe3   :  { %1093 = vmatprep.subr.bf16.mxu0 %v3070_v42  ;;  %1134 = vmatprep.subr.bf16.mxu1 %v3073_v43  ;;  %v3194_v41 = vld [vmem:[#allocation6 + $0x220] ss:$16 sps:$4 sm:$0xff]   ;;  %v3196_v42 = vld [vmem:[#allocation6 + $0x224] ss:$16 sps:$4 sm:$0xff]  }
  0xe4   :  { %v3142_v43 = vld [vmem:[#allocation6 + $0x1a4] ss:$16 sps:$4 sm:$0xff]  }
  0xe6   :  { %1094 = vmatpush2.bf16.msra.mxu0 %v3068_v44  ;;  %1135 = vmatpush2.bf16.msra.mxu1 %v3071_v45  ;;  %v3140_v44 = vld [vmem:[#allocation6 + $0x1a0] ss:$16 sps:$4 sm:$0xff]  }
  0xe7   :  { %1095 = vmatprep.subr.bf16.mxu0 %v3076_v46  ;;  %1136 = vmatprep.subr.bf16.mxu1 %v3079_v47  ;;  %v3200_v45 = vld [vmem:[#allocation6 + $0x200] ss:$16 sps:$4 sm:$0xff]   ;;  %v3202_v46 = vld [vmem:[#allocation6 + $0x204] ss:$16 sps:$4 sm:$0xff]  }
  0xe8   :  { %v3145_v47 = vld [vmem:[#allocation6 + $0x184] ss:$16 sps:$4 sm:$0xff]  }
  0xea   :  { %1096 = vmatpush2.bf16.msra.mxu0 %v3074_v48  ;;  %1137 = vmatpush2.bf16.msra.mxu1 %v3077_v49  ;;  %v3143_v48 = vld [vmem:[#allocation6 + $0x180] ss:$16 sps:$4 sm:$0xff]  }
  0xeb   :  { %1097 = vmatprep.subr.bf16.mxu0 %v3082_v50  ;;  %1138 = vmatprep.subr.bf16.mxu1 %v3085_v51  ;;  %v3206_v49 = vld [vmem:[#allocation6 + $0x3e0] ss:$16 sps:$4 sm:$0xff]   ;;  %v3208_v50 = vld [vmem:[#allocation6 + $0x3e4] ss:$16 sps:$4 sm:$0xff]  }
  0xec   :  { %v3148_v51 = vld [vmem:[#allocation6 + $0x164] ss:$16 sps:$4 sm:$0xff]  }
  0xee   :  { %1098 = vmatpush2.bf16.msra.mxu0 %v3080_v52  ;;  %1139 = vmatpush2.bf16.msra.mxu1 %v3083_v53  ;;  %v3146_v52 = vld [vmem:[#allocation6 + $0x160] ss:$16 sps:$4 sm:$0xff]  }
  0xef   :  { %1099 = vmatprep.subr.bf16.mxu0 %v3088_v54  ;;  %1140 = vmatprep.subr.bf16.mxu1 %v3091_v55  ;;  %v3212_v53 = vld [vmem:[#allocation6 + $0x3c0] ss:$16 sps:$4 sm:$0xff]   ;;  %v3214_v54 = vld [vmem:[#allocation6 + $0x3c4] ss:$16 sps:$4 sm:$0xff]  }
  0xf0   :  { %v3151_v55 = vld [vmem:[#allocation6 + $0x144] ss:$16 sps:$4 sm:$0xff]  }
  0xf2   :  { %1100 = vmatpush2.bf16.msra.mxu0 %v3086_v56  ;;  %1141 = vmatpush2.bf16.msra.mxu1 %v3089_v57  ;;  %v3149_v56 = vld [vmem:[#allocation6 + $0x140] ss:$16 sps:$4 sm:$0xff]  }
  0xf3   :  { %1101 = vmatprep.subr.bf16.mxu0 %v3094_v58  ;;  %1142 = vmatprep.subr.bf16.mxu1 %v3097_v59  ;;  %v3218_v57 = vld [vmem:[#allocation6 + $0x3a0] ss:$16 sps:$4 sm:$0xff]   ;;  %v3220_v58 = vld [vmem:[#allocation6 + $0x3a4] ss:$16 sps:$4 sm:$0xff]  }
  0xf4   :  { %v3154_v59 = vld [vmem:[#allocation6 + $0x124] ss:$16 sps:$4 sm:$0xff]  }
  0xf6   :  { %1102 = vmatpush2.bf16.msra.mxu0 %v3092_v60  ;;  %1143 = vmatpush2.bf16.msra.mxu1 %v3095_v61  ;;  %v3152_v60 = vld [vmem:[#allocation6 + $0x120] ss:$16 sps:$4 sm:$0xff]  }
  0xf7   :  { %1103 = vmatprep.subr.bf16.mxu0 %v3100_v62  ;;  %1144 = vmatprep.subr.bf16.mxu1 %v3103_v63  ;;  %v3224_v61 = vld [vmem:[#allocation6 + $0x380] ss:$16 sps:$4 sm:$0xff]   ;;  %v3226_v62 = vld [vmem:[#allocation6 + $0x384] ss:$16 sps:$4 sm:$0xff]  }
  0xf8   :  { %v3157_v63 = vld [vmem:[#allocation6 + $0x104] ss:$16 sps:$4 sm:$0xff]  }
  0xfa   :  { %1104 = vmatpush2.bf16.msra.mxu0 %v3098_v1  ;;  %1145 = vmatpush2.bf16.msra.mxu1 %v3101_v2  ;;  %v3155_v1 = vld [vmem:[#allocation6 + $0x100] ss:$16 sps:$4 sm:$0xff]  }
  0xfb   :  { %1105 = vmatprep.subr.bf16.mxu0 %v3106_v3  ;;  %1146 = vmatprep.subr.bf16.mxu1 %v3109_v4  ;;  %v3230_v2 = vld [vmem:[#allocation6 + $0x360] ss:$16 sps:$4 sm:$0xff]   ;;  %v3232_v3 = vld [vmem:[#allocation6 + $0x364] ss:$16 sps:$4 sm:$0xff]   ;;  %v3163_v4 = vld [vmem:[#allocation6 + $0xec] ss:$16 sps:$4 sm:$0xff]  }
  0xfe   :  { %1106 = vmatpush2.bf16.msra.mxu0 %v3104_v5  ;;  %1147 = vmatpush2.bf16.msra.mxu1 %v3107_v10  ;;  %v3236_v5 = vld [vmem:[#allocation6 + $0x340] ss:$16 sps:$4 sm:$0xff]   ;;  %v3238_v10 = vld [vmem:[#allocation6 + $0x344] ss:$16 sps:$4 sm:$0xff]  }
  0xff   :  { %1991 = vmatprep.subr.bf16.mxu0 %v3112_v11  ;;  %2032 = vmatprep.subr.bf16.mxu1 %v3160_v19  ;;  %v3244_v11 = vld [vmem:[#allocation6 + $0x324] ss:$16 sps:$4 sm:$0xff]   ;;  %v2699_v19 = vld.sshfl [vmem:[%s3576_s5 + $0x4] sm:$0x33 pattern:$0x75316420] }
 0x101   :  { %1108 = vmatmul.mubr.bf16.vlgmr.msra.gmra.mxu0 %v3507_v6  ;;  %1149 = vmatmul.mubr.bf16.vlgmr.msra.gmra.mxu1 %v3509_v8  ;;  %v3122_v6 = vld [vmem:[#allocation6 + $0x60] ss:$16 sps:$4 sm:$0xff]   ;;  %v3166_v8 = vld [vmem:[#allocation6 + $0x2c4] ss:$16 sps:$4 sm:$0xff]  }
 0x102   :  { %1992 = vmatpush1.bf16.msra.mxu0 %v3110_v12  ;;  %2033 = vmatpush1.bf16.msra.mxu1 %v3158_v18  ;;  %v3242_v12 = vld [vmem:[#allocation6 + $0x320] ss:$16 sps:$4 sm:$0xff]  }
 0x103   :  { %1993 = vmatprep.subr.bf16.mxu0 %v3115_v13  ;;  %2034 = vmatprep.subr.bf16.mxu1 %v3166_v8  ;;  %v3250_v13 = vld [vmem:[#allocation6 + $0x304] ss:$16 sps:$4 sm:$0xff]  }
 0x106   :  { %1994 = vmatpush1.bf16.msra.mxu0 %v3113_v14  ;;  %2035 = vmatpush1.bf16.msra.mxu1 %v3164_v22  ;;  %v3248_v14 = vld [vmem:[#allocation6 + $0x300] ss:$16 sps:$4 sm:$0xff]  }
 0x107   :  { %1995 = vmatprep.subr.bf16.mxu0 %v3118_v15  ;;  %2036 = vmatprep.subr.bf16.mxu1 %v3172_v26  ;;  %v3256_v15 = vld [vmem:[#allocation6 + $0x2ec] ss:$16 sps:$4 sm:$0xff]  }
 0x10a   :  { %1996 = vmatpush1.bf16.msra.mxu0 %v3116_v16  ;;  %2037 = vmatpush1.bf16.msra.mxu1 %v3170_v25  ;;  %v3430_v16 = vmov 1966171168  }
 0x10b   :  { %1997 = vmatprep.subr.bf16.mxu0 %v3121_v17  ;;  %2038 = vmatprep.subr.bf16.mxu1 %v3178_v30  ;;  %v1171_v17 = vunpack.c.l.s4 %v3430_v16 }
 0x10d   :  { %v1172_v18 = vunpack.c.0.s8 %v1171_v17  ;;  %v3245_v17 = vld [vmem:[#allocation6 + $0x128] ss:$16 sps:$4 sm:$0xff]  }
 0x10e   :  { %1998 = vmatpush1.bf16.msra.mxu0 %v3119_v20  ;;  %2039 = vmatpush1.bf16.msra.mxu1 %v3176_v29 }
 0x10f   :  { %1999 = vmatprep.subr.bf16.mxu0 %v3124_v21  ;;  %2040 = vmatprep.subr.bf16.mxu1 %v3184_v34  ;;  %v3519_v20 = vsub.s32 %v1172_v18, %v3482_v7  ;;  %v1169_v21 = vcombine.high %v2699_v19, %v2699_v19 }
 0x111   :  { %v3525_v22 = vrot.slane %v1169_v21, %v3519_v20 }
 0x112   :  { %2000 = vmatpush1.bf16.msra.mxu0 %v3122_v6  ;;  %2041 = vmatpush1.bf16.msra.mxu1 %v3182_v33  ;;  %v3522_v6 = vrot.slane %v2699_v19, %v3519_v20 }
 0x113   :  { %2001 = vmatprep.subr.bf16.mxu0 %v3127_v23  ;;  %2042 = vmatprep.subr.bf16.mxu1 %v3190_v38  ;;  %v1194_v23 = vpack.i.b16 %v3525_v22, %v3525_v22 }
 0x114   :  { %v1187_v8 = vpack.i.b16 %v3522_v6, %v3522_v6 }
 0x116   :  { %2002 = vmatpush1.bf16.msra.mxu0 %v3125_v24  ;;  %2043 = vmatpush1.bf16.msra.mxu1 %v3188_v37 }
 0x117   :  { %2003 = vmatprep.subr.bf16.mxu0 %v3130_v27  ;;  %2044 = vmatprep.subr.bf16.mxu1 %v3196_v42  ;;  %v1192_v27 = vrot.slane %v1187_v8, %v3488_v9  ;;  %v3169_v42 = vld [vmem:[#allocation6 + $0xcc] ss:$16 sps:$4 sm:$0xff]  }
 0x11a   :  { %2004 = vmatpush1.bf16.msra.mxu0 %v3128_v28  ;;  %2045 = vmatpush1.bf16.msra.mxu1 %v3194_v41 }
 0x11b   :  { %2005 = vmatprep.subr.bf16.mxu0 %v3133_v31  ;;  %2046 = vmatprep.subr.bf16.mxu1 %v3202_v46  ;;  %v1199_v31 = vrot.slane %v1194_v23, %v3488_v9  ;;  %v3181_v46 = vld [vmem:[#allocation6 + $0x8c] ss:$16 sps:$4 sm:$0xff]  }
 0x11e   :  { %2006 = vmatpush1.bf16.msra.mxu0 %v3131_v32  ;;  %2047 = vmatpush1.bf16.msra.mxu1 %v3200_v45  ;;  %v3173_v45 = vld [vmem:[#allocation6 + $0xa8] ss:$16 sps:$4 sm:$0xff]  }
 0x11f   :  { %2007 = vmatprep.subr.bf16.mxu0 %v3136_v35  ;;  %2048 = vmatprep.subr.bf16.mxu1 %v3208_v50  ;;  %v3193_v50 = vld [vmem:[#allocation6 + $0x4c] ss:$16 sps:$4 sm:$0xff]  }
 0x122   :  { %2008 = vmatpush2.bf16.msra.mxu0 %v3134_v36  ;;  %2049 = vmatpush2.bf16.msra.mxu1 %v3206_v49  ;;  %v3185_v49 = vld [vmem:[#allocation6 + $0x68] ss:$16 sps:$4 sm:$0xff]  }
 0x123   :  { %2009 = vmatprep.subr.bf16.mxu0 %v3139_v39  ;;  %2050 = vmatprep.subr.bf16.mxu1 %v3214_v54  ;;  %v3205_v54 = vld [vmem:[#allocation6 + $0xc] ss:$16 sps:$4 sm:$0xff]  }
 0x126   :  { %2010 = vmatpush2.bf16.msra.mxu0 %v3137_v40  ;;  %2051 = vmatpush2.bf16.msra.mxu1 %v3212_v53  ;;  %v3161_v40 = vld [vmem:[#allocation6 + $0xe8] ss:$16 sps:$4 sm:$0xff]  }
 0x127   :  { %2011 = vmatprep.subr.bf16.mxu0 %v3142_v43  ;;  %2052 = vmatprep.subr.bf16.mxu1 %v3220_v58  ;;  %v3167_v43 = vld [vmem:[#allocation6 + $0xc8] ss:$16 sps:$4 sm:$0xff]   ;;  %v3217_v58 = vld [vmem:[#allocation6 + $0x1cc] ss:$16 sps:$4 sm:$0xff]  }
 0x128   :  { %v3197_v53 = vld [vmem:[#allocation6 + $0x28] ss:$16 sps:$4 sm:$0xff]  }
 0x12a   :  { %2012 = vmatpush2.bf16.msra.mxu0 %v3140_v44  ;;  %2053 = vmatpush2.bf16.msra.mxu1 %v3218_v57  ;;  %v3175_v44 = vld [vmem:[#allocation6 + $0xac] ss:$16 sps:$4 sm:$0xff]   ;;  %v3209_v57 = vld [vmem:[#allocation6 + $0x1e8] ss:$16 sps:$4 sm:$0xff]  }
 0x12b   :  { %2013 = vmatprep.subr.bf16.mxu0 %v3145_v47  ;;  %2054 = vmatprep.subr.bf16.mxu1 %v3226_v62  ;;  %v3179_v47 = vld [vmem:[#allocation6 + $0x88] ss:$16 sps:$4 sm:$0xff]   ;;  %v3229_v62 = vld [vmem:[#allocation6 + $0x18c] ss:$16 sps:$4 sm:$0xff]  }
 0x12e   :  { %2014 = vmatpush2.bf16.msra.mxu0 %v3143_v48  ;;  %2055 = vmatpush2.bf16.msra.mxu1 %v3224_v61  ;;  %v3187_v48 = vld [vmem:[#allocation6 + $0x6c] ss:$16 sps:$4 sm:$0xff]   ;;  %v3221_v61 = vld [vmem:[#allocation6 + $0x1a8] ss:$16 sps:$4 sm:$0xff]  }
 0x12f   :  { %2015 = vmatprep.subr.bf16.mxu0 %v3148_v51  ;;  %2056 = vmatprep.subr.bf16.mxu1 %v3232_v3  ;;  %v3191_v51 = vld [vmem:[#allocation6 + $0x48] ss:$16 sps:$4 sm:$0xff]   ;;  %v1184_v3 = vcombine.high %v3522_v6, %v3522_v6  ;;  %v3253_v6 = vld [vmem:[#allocation6 + $0x10c] ss:$16 sps:$4 sm:$0xff]  }
 0x132   :  { %2016 = vmatpush2.bf16.msra.mxu0 %v3146_v52  ;;  %2057 = vmatpush2.bf16.msra.mxu1 %v3230_v2  ;;  %v3199_v52 = vld [vmem:[#allocation6 + $0x2c] ss:$16 sps:$4 sm:$0xff]   ;;  %v3233_v2 = vld [vmem:[#allocation6 + $0x168] ss:$16 sps:$4 sm:$0xff]  }
 0x133   :  { %2017 = vmatprep.subr.bf16.mxu0 %v3151_v55  ;;  %2058 = vmatprep.subr.bf16.mxu1 %v3238_v10  ;;  %v3203_v55 = vld [vmem:[#allocation6 + $0x8] ss:$16 sps:$4 sm:$0xff]  }
 0x134   :  { %v3239_v10 = vld [vmem:[#allocation6 + $0x148] ss:$16 sps:$4 sm:$0xff]  }
 0x136   :  { %2018 = vmatpush2.bf16.msra.mxu0 %v3149_v56  ;;  %2059 = vmatpush2.bf16.msra.mxu1 %v3236_v5  ;;  %v3211_v56 = vld [vmem:[#allocation6 + $0x1ec] ss:$16 sps:$4 sm:$0xff]   ;;  %v1185_v5 = vcombine.high %v3525_v22, %v3525_v22 }
 0x137   :  { %2019 = vmatprep.subr.bf16.mxu0 %v3154_v59  ;;  %2060 = vmatprep.subr.bf16.mxu1 %v3244_v11  ;;  %v3215_v59 = vld [vmem:[#allocation6 + $0x1c8] ss:$16 sps:$4 sm:$0xff]   ;;  %v1201_v11 = vpack.i.b16 %v1184_v3, %v1184_v3  ;;  %v3292_v3 = vld [vmem:[#allocation6 + $0x36c] ss:$16 sps:$4 sm:$0xff]  }
 0x139   :  { %v1206_v18 = vrot.slane %v1201_v11, %v3488_v9  ;;  %v3298_v11 = vld [vmem:[#allocation6 + $0x32c] ss:$16 sps:$4 sm:$0xff]  }
 0x13a   :  { %2020 = vmatpush2.bf16.msra.mxu0 %v3152_v60  ;;  %2061 = vmatpush2.bf16.msra.mxu1 %v3242_v12  ;;  %v3223_v60 = vld [vmem:[#allocation6 + $0x1ac] ss:$16 sps:$4 sm:$0xff]  }
 0x13b   :  { %2021 = vmatprep.subr.bf16.mxu0 %v3157_v63  ;;  %2062 = vmatprep.subr.bf16.mxu1 %v3250_v13  ;;  %v3227_v63 = vld [vmem:[#allocation6 + $0x188] ss:$16 sps:$4 sm:$0xff]   ;;  %v3247_v12 = vld [vmem:[#allocation6 + $0x12c] ss:$16 sps:$4 sm:$0xff]   ;;  %v1208_v13 = vpack.i.b16 %v1185_v5, %v1185_v5 }
 0x13c   :  { %v3295_v5 = vld [vmem:[#allocation6 + $0x34c] ss:$16 sps:$4 sm:$0xff]  }
 0x13d   :  { %v1213_v22 = vrot.slane %v1208_v13, %v3488_v9  ;;  %v3301_v13 = vld [vmem:[#allocation6 + $0x30c] ss:$16 sps:$4 sm:$0xff]  }
 0x13e   :  { %2022 = vmatpush2.bf16.msra.mxu0 %v3155_v1  ;;  %2063 = vmatpush2.bf16.msra.mxu1 %v3248_v14  ;;  %v3235_v1 = vld [vmem:[#allocation6 + $0x16c] ss:$16 sps:$4 sm:$0xff]  }
 0x13f   :  { %2073 = vmatprep.subr.bf16.mxu0 %v3163_v4  ;;  %2114 = vmatprep.subr.bf16.mxu1 %v3256_v15  ;;  %v3241_v4 = vld [vmem:[#allocation6 + $0x14c] ss:$16 sps:$4 sm:$0xff]  }
 0x181   :  { %v1027_v24 = vpop.f32.mrf.mxu0  ;;  %v1068_v25 = vpop.f32.mrf.mxu1 }
 0x182   :  { %v1069_v26 = vadd.f32 %v1068_v25, %v1027_v24 }
 0x183   :  { %v1029_v7 = vpop.f32.mrf.mxu0  ;;  %v1070_v28 = vpop.f32.mrf.mxu1 }
 0x184   :  { %v1157_v29 = vpack.c.bf16 %v1069_v26, %v1069_v26  ;;  %v1071_v30 = vadd.f32 %v1070_v28, %v1029_v7 }
 0x185   :  { %v1031_v32 = vpop.f32.mrf.mxu0  ;;  %v1072_v33 = vpop.f32.mrf.mxu1 }
 0x186   :  { %v1158_v34 = vpack.c.bf16 %v1071_v30, %v1071_v30  ;;  %v1214_v35 = vadd.bf16 %v1192_v27, %v1157_v29  ;;  %v3251_v27 = vld [vmem:[#allocation6 + $0x108] ss:$16 sps:$4 sm:$0xff]  }
 0x187   :  { %v1032_v36 = vpop.f32.mrf.mxu0  ;;  %v1073_v37 = vpop.f32.mrf.mxu1  ;;  %v3254_v32 = vld [vmem:[#allocation6 + $0x2e8] ss:$16 sps:$4 sm:$0xff]  }
 0x188   :  { %v1215_v38 = vadd.bf16 %v1199_v31, %v1158_v34  ;;  %v3535_v41 = vmax.bf16 %v3428_v0, %v1214_v35  ;;  %v3259_v34 = vld [vmem:[#allocation6 + $0x2cc] ss:$16 sps:$4 sm:$0xff]   ;;  %v3257_v35 = vld [vmem:[#allocation6 + $0x2c8] ss:$16 sps:$4 sm:$0xff]  }
 0x189   :  { %v3262_v36 = vld [vmem:[#allocation6 + $0x2ac] ss:$16 sps:$4 sm:$0xff]   ;;  %v3260_v37 = vld [vmem:[#allocation6 + $0x2a8] ss:$16 sps:$4 sm:$0xff]  }
 0x18a   :  { %v1219_v39 = vmax.bf16 %v3428_v0, %v1215_v38  ;;  %v3265_v38 = vld [vmem:[#allocation6 + $0x28c] ss:$16 sps:$4 sm:$0xff]  }
 0x18c   :  { %2023 = vmatprep.mubr.bf16.mxu0 %v1219_v39 }
 0x18d   :  { %2024 = vmatmul.mubr.bf16.vlgmr.msra.gmra.mxu0 %v3535_v41 }
 0x18e   :  { %2074 = vmatpush1.bf16.msra.mxu0 %v3161_v40  ;;  %2105 = vmatprep.mubr.bf16.mxu0 %v1219_v39  ;;  %v3302_v39 = vld [vmem:[#allocation7 + $0x78] sm:$0xff]  }
 0x18f   :  { %2075 = vmatprep.subr.bf16.mxu0 %v3169_v42  ;;  %v3303_v40 = vld [vmem:[#allocation7 + $0x38] sm:$0xff]   ;;  %v3304_v42 = vld [vmem:[#allocation7 + $0x70] sm:$0xff]  }
 0x192   :  { %2076 = vmatpush1.bf16.msra.mxu0 %v3167_v43  ;;  %v3263_v43 = vld [vmem:[#allocation6 + $0x288] ss:$16 sps:$4 sm:$0xff]  }
 0x193   :  { %2077 = vmatprep.subr.bf16.mxu0 %v3175_v44  ;;  %v3305_v44 = vld [vmem:[#allocation7 + $0x30] sm:$0xff]  }
 0x196   :  { %2078 = vmatpush1.bf16.msra.mxu0 %v3173_v45  ;;  %v3268_v45 = vld [vmem:[#allocation6 + $0x26c] ss:$16 sps:$4 sm:$0xff]  }
 0x197   :  { %2079 = vmatprep.subr.bf16.mxu0 %v3181_v46  ;;  %v3266_v46 = vld [vmem:[#allocation6 + $0x268] ss:$16 sps:$4 sm:$0xff]  }
 0x19a   :  { %2080 = vmatpush1.bf16.msra.mxu0 %v3179_v47  ;;  %v3307_v47 = vld [vmem:[#allocation7 + $0x28] sm:$0xff]  }
 0x19b   :  { %2081 = vmatprep.subr.bf16.mxu0 %v3187_v48  ;;  %v3271_v48 = vld [vmem:[#allocation6 + $0x24c] ss:$16 sps:$4 sm:$0xff]  }
 0x19e   :  { %2082 = vmatpush1.bf16.msra.mxu0 %v3185_v49  ;;  %v3308_v49 = vld [vmem:[#allocation7 + $0x60] sm:$0xff]  }
 0x19f   :  { %2083 = vmatprep.subr.bf16.mxu0 %v3193_v50  ;;  %v3269_v50 = vld [vmem:[#allocation6 + $0x248] ss:$16 sps:$4 sm:$0xff]  }
 0x1a2   :  { %2084 = vmatpush1.bf16.msra.mxu0 %v3191_v51  ;;  %v3309_v51 = vld [vmem:[#allocation7 + $0x20] sm:$0xff]  }
 0x1a3   :  { %2085 = vmatprep.subr.bf16.mxu0 %v3199_v52  ;;  %v3274_v52 = vld [vmem:[#allocation6 + $0x22c] ss:$16 sps:$4 sm:$0xff]  }
 0x1a6   :  { %2086 = vmatpush1.bf16.msra.mxu0 %v3197_v53  ;;  %v3310_v53 = vld [vmem:[#allocation7 + $0x58] sm:$0xff]  }
 0x1a7   :  { %2087 = vmatprep.subr.bf16.mxu0 %v3205_v54  ;;  %v3272_v54 = vld [vmem:[#allocation6 + $0x228] ss:$16 sps:$4 sm:$0xff]  }
 0x1aa   :  { %2088 = vmatpush1.bf16.msra.mxu0 %v3203_v55  ;;  %v3311_v55 = vld [vmem:[#allocation7 + $0x18] sm:$0xff]  }
 0x1ab   :  { %2089 = vmatprep.subr.bf16.mxu0 %v3211_v56  ;;  %v3277_v56 = vld [vmem:[#allocation6 + $0x20c] ss:$16 sps:$4 sm:$0xff]  }
 0x1ae   :  { %2090 = vmatpush2.bf16.msra.mxu0 %v3209_v57  ;;  %v3275_v57 = vld [vmem:[#allocation6 + $0x208] ss:$16 sps:$4 sm:$0xff]  }
 0x1af   :  { %2091 = vmatprep.subr.bf16.mxu0 %v3217_v58  ;;  %v3280_v58 = vld [vmem:[#allocation6 + $0x3ec] ss:$16 sps:$4 sm:$0xff]  }
 0x1b2   :  { %2092 = vmatpush2.bf16.msra.mxu0 %v3215_v59  ;;  %v3278_v59 = vld [vmem:[#allocation6 + $0x3e8] ss:$16 sps:$4 sm:$0xff]  }
 0x1b3   :  { %2093 = vmatprep.subr.bf16.mxu0 %v3223_v60  ;;  %v3283_v60 = vld [vmem:[#allocation6 + $0x3cc] ss:$16 sps:$4 sm:$0xff]  }
 0x1b6   :  { %2094 = vmatpush2.bf16.msra.mxu0 %v3221_v61  ;;  %v3281_v61 = vld [vmem:[#allocation6 + $0x3c8] ss:$16 sps:$4 sm:$0xff]  }
 0x1b7   :  { %2095 = vmatprep.subr.bf16.mxu0 %v3229_v62  ;;  %v3286_v62 = vld [vmem:[#allocation6 + $0x3ac] ss:$16 sps:$4 sm:$0xff]  }
 0x1ba   :  { %2096 = vmatpush2.bf16.msra.mxu0 %v3227_v63  ;;  %v3284_v63 = vld [vmem:[#allocation6 + $0x3a8] ss:$16 sps:$4 sm:$0xff]  }
 0x1bb   :  { %2097 = vmatprep.subr.bf16.mxu0 %v3235_v1  ;;  %v3289_v1 = vld [vmem:[#allocation6 + $0x38c] ss:$16 sps:$4 sm:$0xff]  }
 0x1be   :  { %2098 = vmatpush2.bf16.msra.mxu0 %v3233_v2  ;;  %v3287_v2 = vld [vmem:[#allocation6 + $0x388] ss:$16 sps:$4 sm:$0xff]  }
 0x1bf   :  { %2099 = vmatprep.subr.bf16.mxu0 %v3241_v4  ;;  %v3290_v4 = vld [vmem:[#allocation6 + $0x368] ss:$16 sps:$4 sm:$0xff]  }
 0x1c1   :  { %v1109_v14 = vpop.f32.mrf.mxu0  ;;  %v1150_v15 = vpop.f32.mrf.mxu1 }
 0x1c2   :  { %v1151_v16 = vadd.f32 %v1150_v15, %v1109_v14  ;;  %2100 = vmatpush2.bf16.msra.mxu0 %v3239_v10  ;;  %v3293_v10 = vld [vmem:[#allocation6 + $0x348] ss:$16 sps:$4 sm:$0xff]   ;;  %v3312_v15 = vld [vmem:[#allocation7 + $0x50] sm:$0xff]  }
 0x1c3   :  { %v1111_v19 = vpop.f32.mrf.mxu0  ;;  %v1152_v21 = vpop.f32.mrf.mxu1  ;;  %2101 = vmatprep.subr.bf16.mxu0 %v3247_v12  ;;  %v3296_v12 = vld [vmem:[#allocation6 + $0x328] ss:$16 sps:$4 sm:$0xff]  }
 0x1c4   :  { %v1159_v8 = vpack.c.bf16 %v1151_v16, %v1151_v16  ;;  %v1153_v23 = vadd.f32 %v1152_v21, %v1111_v19  ;;  %v3299_v14 = vld [vmem:[#allocation6 + $0x308] ss:$16 sps:$4 sm:$0xff]   ;;  %v3313_v16 = vld [vmem:[#allocation7 + $0x10] sm:$0xff]   ;;  %v3316_v19 = vld [vmem:[#allocation7 + $0x40] sm:$0xff]  }
 0x1c5   :  { %v1113_v24 = vpop.f32.mrf.mxu0  ;;  %v1154_v25 = vpop.f32.mrf.mxu1  ;;  %v3317_v21 = vld [vmem:[#allocation7] sm:$0xff]  }
 0x1c6   :  { %v1160_v26 = vpack.c.bf16 %v1153_v23, %v1153_v23  ;;  %2102 = vmatpush2.bf16.msra.mxu0 %v3245_v17  ;;  %v1216_v7 = vadd.bf16 %v1206_v18, %v1159_v8  ;;  %v3314_v17 = vld [vmem:[#allocation7 + $0x48] sm:$0xff]   ;;  %v3319_v8 = vld [vmem:[#allocation7 + $0xb8] sm:$0xff]   ;;  %v3320_v23 = vld [vmem:[#allocation7 + $0xf0] sm:$0xff]  }
 0x1c7   :  { %v1114_v28 = vpop.f32.mrf.mxu0  ;;  %v1155_v29 = vpop.f32.mrf.mxu1  ;;  %2103 = vmatprep.subr.bf16.mxu0 %v3253_v6  ;;  %v3315_v18 = vld [vmem:[#allocation7 + $0x8] sm:$0xff]   ;;  %v3318_v6 = vld [vmem:[#allocation7 + $0xf8] sm:$0xff]  }
 0x1c8   :  { %v1217_v30 = vadd.bf16 %v1213_v22, %v1160_v26  ;;  %v3546_v33 = vmax.bf16 %v3428_v0, %v1216_v7  ;;  %v3321_v22 = vld [vmem:[#allocation7 + $0xb0] sm:$0xff]   ;;  %v3322_v24 = vld [vmem:[#allocation7 + $0xe8] sm:$0xff]   ;;  %v3324_v26 = vld [vmem:[#allocation7 + $0xe0] sm:$0xff]  }
 0x1c9   :  { %v3323_v25 = vld [vmem:[#allocation7 + $0xa8] sm:$0xff]   ;;  %v3326_v7 = vld [vmem:[#allocation7 + $0xd8] sm:$0xff]   ;;  %v3328_v29 = vld [vmem:[#allocation7 + $0xd0] sm:$0xff]  }
 0x1ca   :  { %2104 = vmatpush2.bf16.msra.mxu0 %v3251_v27  ;;  %v1221_v31 = vmax.bf16 %v3428_v0, %v1217_v30  ;;  %v3325_v27 = vld [vmem:[#allocation7 + $0xa0] sm:$0xff]   ;;  %v3327_v28 = vld [vmem:[#allocation7 + $0x98] sm:$0xff]   ;;  %v3329_v30 = vld [vmem:[#allocation7 + $0x90] sm:$0xff]  }
 0x1cb   :  { %2861 = vmatprep.subr.bf16.mxu0 %v3302_v39  ;;  %v2828_v39 = vld.sshfl [vmem:[%s3576_s5 + $0x8] sm:$0x33 pattern:$0x75316420] }
 0x1cc   :  { %2064 = vmatprep.mubr.bf16.mxu1 %v1221_v31 }
 0x1cd   :  { %2065 = vmatmul.mubr.bf16.vlgmr.msra.gmra.mxu1 %v3546_v33  ;;  %2106 = vmatmul.mubr.bf16.vlgmr.msra.gmra.mxu0 %v3535_v41  ;;  %v3306_v41 = vld [vmem:[#allocation7 + $0x68] sm:$0xff]  }
 0x1ce   :  { %2115 = vmatpush1.bf16.msra.mxu1 %v3254_v32  ;;  %2146 = vmatprep.mubr.bf16.mxu1 %v1221_v31 }
 0x1cf   :  { %2116 = vmatprep.subr.bf16.mxu1 %v3259_v34  ;;  %2862 = vmatpush3.bf16.msra.mxu0 %v3303_v40  ;;  %v3331_v34 = vld [vmem:[#allocation7 + $0x88] sm:$0xff]   ;;  %v2167_v40 = vcombine.high %v2828_v39, %v2828_v39 }
 0x1d0   :  { %2863 = vmatprep.subr.bf16.mxu0 %v3304_v42  ;;  %v2174_v42 = vrot.slane %v2828_v39, %v3519_v20 }
 0x1d2   :  { %2117 = vmatpush1.bf16.msra.mxu1 %v3257_v35 }
 0x1d3   :  { %2118 = vmatprep.subr.bf16.mxu1 %v3262_v36  ;;  %2864 = vmatpush3.bf16.msra.mxu0 %v3305_v44  ;;  %v2185_v44 = vpack.i.b16 %v2174_v42, %v2174_v42 }
 0x1d4   :  { %2865 = vmatprep.subr.bf16.mxu0 %v3306_v41 }
 0x1d6   :  { %2119 = vmatpush1.bf16.msra.mxu1 %v3260_v37  ;;  %v3332_v37 = vld [vmem:[#allocation7 + $0xc0] sm:$0xff]  }
 0x1d7   :  { %2120 = vmatprep.subr.bf16.mxu1 %v3265_v38  ;;  %2866 = vmatpush3.bf16.msra.mxu0 %v3307_v47  ;;  %v3333_v38 = vld [vmem:[#allocation7 + $0x80] sm:$0xff]  }
 0x1d8   :  { %2867 = vmatprep.subr.bf16.mxu0 %v3308_v49 }
 0x1da   :  { %2121 = vmatpush1.bf16.msra.mxu1 %v3263_v43  ;;  %v2181_v43 = vrot.slane %v2167_v40, %v3519_v20 }
 0x1db   :  { %2122 = vmatprep.subr.bf16.mxu1 %v3268_v45  ;;  %2868 = vmatpush3.bf16.msra.mxu0 %v3309_v51 }
 0x1dc   :  { %2869 = vmatprep.subr.bf16.mxu0 %v3310_v53  ;;  %v2192_v45 = vpack.i.b16 %v2181_v43, %v2181_v43 }
 0x1de   :  { %2123 = vmatpush1.bf16.msra.mxu1 %v3266_v46  ;;  %v2197_v53 = vrot.slane %v2192_v45, %v3488_v9 }
 0x1df   :  { %2124 = vmatprep.subr.bf16.mxu1 %v3271_v48  ;;  %2870 = vmatpush3.bf16.msra.mxu0 %v3311_v55  ;;  %v2190_v48 = vrot.slane %v2185_v44, %v3488_v9 }
 0x1e0   :  { %2871 = vmatprep.subr.bf16.mxu0 %v3312_v15 }
 0x1e2   :  { %2125 = vmatpush1.bf16.msra.mxu1 %v3269_v50 }
 0x1e3   :  { %2126 = vmatprep.subr.bf16.mxu1 %v3274_v52  ;;  %2872 = vmatpush3.bf16.msra.mxu0 %v3313_v16 }
 0x1e4   :  { %2873 = vmatprep.subr.bf16.mxu0 %v3314_v17 }
 0x1e6   :  { %2127 = vmatpush1.bf16.msra.mxu1 %v3272_v54 }
 0x1e7   :  { %2128 = vmatprep.subr.bf16.mxu1 %v3277_v56  ;;  %2874 = vmatpush3.bf16.msra.mxu0 %v3315_v18 }
 0x1e8   :  { %2875 = vmatprep.subr.bf16.mxu0 %v3316_v19 }
 0x1ea   :  { %2129 = vmatpush1.bf16.msra.mxu1 %v3275_v57 }
 0x1eb   :  { %2130 = vmatprep.subr.bf16.mxu1 %v3280_v58  ;;  %2876 = vmatpush3.bf16.msra.mxu0 %v3317_v21 }
 0x1ee   :  { %2131 = vmatpush2.bf16.msra.mxu1 %v3278_v59 }
 0x1ef   :  { %2132 = vmatprep.subr.bf16.mxu1 %v3283_v60 }
 0x1f2   :  { %2133 = vmatpush2.bf16.msra.mxu1 %v3281_v61 }
 0x1f3   :  { %2134 = vmatprep.subr.bf16.mxu1 %v3286_v62  ;;  %v2182_v62 = vcombine.high %v2174_v42, %v2174_v42 }
 0x1f6   :  { %2135 = vmatpush2.bf16.msra.mxu1 %v3284_v63  ;;  %v2183_v63 = vcombine.high %v2181_v43, %v2181_v43 }
 0x1f7   :  { %2136 = vmatprep.subr.bf16.mxu1 %v3289_v1  ;;  %v2199_v1 = vpack.i.b16 %v2182_v62, %v2182_v62 }
 0x1fa   :  { %2137 = vmatpush2.bf16.msra.mxu1 %v3287_v2  ;;  %v2206_v2 = vpack.i.b16 %v2183_v63, %v2183_v63 }
 0x1fb   :  { %2138 = vmatprep.subr.bf16.mxu1 %v3292_v3 }
 0x1fe   :  { %2139 = vmatpush2.bf16.msra.mxu1 %v3290_v4 }
 0x1ff   :  { %2140 = vmatprep.subr.bf16.mxu1 %v3295_v5  ;;  %v2204_v5 = vrot.slane %v2199_v1, %v3488_v9 }
 0x202   :  { %2141 = vmatpush2.bf16.msra.mxu1 %v3293_v10 }
 0x203   :  { %2142 = vmatprep.subr.bf16.mxu1 %v3298_v11 }
 0x206   :  { %2143 = vmatpush2.bf16.msra.mxu1 %v3296_v12 }
 0x207   :  { %2144 = vmatprep.subr.bf16.mxu1 %v3301_v13  ;;  %v2211_v13 = vrot.slane %v2206_v2, %v3488_v9 }
 0x20a   :  { %2145 = vmatpush2.bf16.msra.mxu1 %v3299_v14 }
 0x20b   :  { %2883 = vmatprep.subr.bf16.mxu1 %v3318_v6 }
 0x20d   :  { %2147 = vmatmul.mubr.bf16.vlgmr.msra.gmra.mxu1 %v3546_v33  ;;  %v3330_v33 = vld [vmem:[#allocation7 + $0xc8] sm:$0xff]  }
 0x20e   :  { %2884 = vmatpush3.bf16.msra.mxu1 %v3319_v8 }
 0x20f   :  { %2885 = vmatprep.subr.bf16.mxu1 %v3320_v23 }
 0x212   :  { %2886 = vmatpush3.bf16.msra.mxu1 %v3321_v22 }
 0x213   :  { %2887 = vmatprep.subr.bf16.mxu1 %v3322_v24  ;;  %v2220_v24 = vld [vmem:[%s3576_s5 + $0xc] sm:$0x1] }
 0x216   :  { %2888 = vmatpush3.bf16.msra.mxu1 %v3323_v25  ;;  %v2285_v25 = vunpack.c.l.bf16 %v2220_v24 }
 0x217   :  { %2889 = vmatprep.subr.bf16.mxu1 %v3324_v26 }
 0x218   :  { %v2289_v26 = vrot.slane %v2285_v25, %v3488_v9 }
 0x21a   :  { %2890 = vmatpush3.bf16.msra.mxu1 %v3325_v27 }
 0x21b   :  { %2891 = vmatprep.subr.bf16.mxu1 %v3326_v7 }
 0x21e   :  { %2892 = vmatpush3.bf16.msra.mxu1 %v3327_v28 }
 0x21f   :  { %2893 = vmatprep.subr.bf16.mxu1 %v3328_v29 }
 0x222   :  { %2894 = vmatpush3.bf16.msra.mxu1 %v3329_v30 }
 0x223   :  { %2895 = vmatprep.subr.bf16.mxu1 %v3330_v33 }
 0x226   :  { %2896 = vmatpush3.bf16.msra.mxu1 %v3331_v34 }
 0x227   :  { %2897 = vmatprep.subr.bf16.mxu1 %v3332_v37 }
 0x22a   :  { %2898 = vmatpush3.bf16.msra.mxu1 %v3333_v38 }
 0x24d   :  { %v2025_v31 = vpop.f32.mrf.mxu0 }
 0x24f   :  { %v2027_v32 = vpop.f32.mrf.mxu0 }
 0x251   :  { %v2029_v35 = vpop.f32.mrf.mxu0 }
 0x253   :  { %v2030_v36 = vpop.f32.mrf.mxu0 }
 0x28d   :  { %v2066_v41 = vpop.f32.mrf.mxu1  ;;  %v2107_v46 = vpop.f32.mrf.mxu0 }
 0x28e   :  { %v2067_v47 = vadd.f32 %v2066_v41, %v2025_v31 }
 0x28f   :  { %v2068_v49 = vpop.f32.mrf.mxu1  ;;  %v2109_v50 = vpop.f32.mrf.mxu0 }
 0x290   :  { %v2155_v51 = vpack.c.bf16 %v2067_v47, %v2067_v47  ;;  %v2069_v52 = vadd.f32 %v2068_v49, %v2027_v32 }
 0x291   :  { %v2070_v54 = vpop.f32.mrf.mxu1  ;;  %v2111_v55 = vpop.f32.mrf.mxu0 }
 0x292   :  { %v2156_v56 = vpack.c.bf16 %v2069_v52, %v2069_v52  ;;  %v2212_v57 = vadd.bf16 %v2190_v48, %v2155_v51 }
 0x293   :  { %v2071_v58 = vpop.f32.mrf.mxu1  ;;  %v2112_v59 = vpop.f32.mrf.mxu0 }
 0x294   :  { %v2213_v20 = vadd.bf16 %v2197_v53, %v2156_v56  ;;  %v2216_v61 = vmax.bf16 %v3428_v0, %v2212_v57 }
 0x296   :  { %v2217_v60 = vmax.bf16 %v3428_v0, %v2213_v20 }
 0x298   :  { %2514 = vmatprep.mubr.bf16.mxu0 %v2217_v60 }
 0x299   :  { %2515 = vmatmul.mubr.bf16.vlgmr.msra.gmra.mxu0 %v2216_v61 }
 0x2cd   :  { %v2148_v3 = vpop.f32.mrf.mxu1 }
 0x2ce   :  { %v2149_v4 = vadd.f32 %v2148_v3, %v2107_v46 }
 0x2cf   :  { %v2150_v10 = vpop.f32.mrf.mxu1 }
 0x2d0   :  { %v2157_v11 = vpack.c.bf16 %v2149_v4, %v2149_v4  ;;  %v2151_v12 = vadd.f32 %v2150_v10, %v2109_v50 }
 0x2d1   :  { %v2152_v14 = vpop.f32.mrf.mxu1 }
 0x2d2   :  { %v2158_v15 = vpack.c.bf16 %v2151_v12, %v2151_v12  ;;  %v2214_v16 = vadd.bf16 %v2204_v5, %v2157_v11 }
 0x2d3   :  { %v2153_v17 = vpop.f32.mrf.mxu1 }
 0x2d4   :  { %v2215_v18 = vadd.bf16 %v2211_v13, %v2158_v15  ;;  %v2218_v21 = vmax.bf16 %v3428_v0, %v2214_v16 }
 0x2d6   :  { %v2219_v19 = vmax.bf16 %v3428_v0, %v2215_v18 }
 0x2d8   :  { %2554 = vmatprep.mubr.bf16.mxu1 %v2219_v19 }
 0x2d9   :  { %2555 = vmatmul.mubr.bf16.vlgmr.msra.gmra.mxu1 %v2218_v21 }
 0x359   :  { %v2877_v6 = vpop.f32.mrf.mxu0 }
 0x35b   :  { %v2878_v8 = vpop.f32.mrf.mxu0 }
 0x35c   :  { %v2879_v27 = vadd.f32 %v2878_v8, %v2877_v6 }
 0x35d   :  { %v2880_v23 = vpop.f32.mrf.mxu0 }
 0x35e   :  { %v2517_v29 = vadd.f32 %v2879_v27, %v2289_v26 }
 0x35f   :  { %v2881_v22 = vpop.f32.mrf.mxu0 }
 0x399   :  { %v2899_v7 = vpop.f32.mrf.mxu1 }
 0x39b   :  { %v2900_v28 = vpop.f32.mrf.mxu1 }
 0x39c   :  { %v2901_v30 = vadd.f32 %v2900_v28, %v2899_v7 }
 0x39d   :  { %v2902_v0 = vpop.f32.mrf.mxu1 }
 0x39e   :  { %v2557_v31 = vadd.f32 %v2901_v30, %v2517_v29 }
 0x39f   :  { %v2903_v32 = vpop.f32.mrf.mxu1 }
 0x3a0   :  { %2563 = vst.msk [vmem:[%s3577_s6] sm:$0xff] %vm2562_vm0, %v2557_v31 }
 0x3a1   :  { %2568 = vsyncpa [#allocation3], 1 }
 0x3a2   :  { %2569 = vsyncpa [#allocation5], 1 }
 0x3a3   :  { %2570 = vsyncpa [#allocation8], 1 }

</bundles_post_ra>
